<compile_context>
chip_gen: v7x
topology: tpu7x:2x2x1
jax: 0.10.0
libtpu: 0.0.40
codegen_flags: <defaults>
</compile_context>

<pallas_src>
import jax
import jax.numpy as jnp
from jax import lax
from jax.experimental import pallas as pl
from jax.experimental.pallas import tpu as pltpu

FEAT_DIM = 1792      # backbone feature width fed to the replaced logits layer
EMB_DIM = 128        # embedding_size
KPAD = 128           # pooled-channel axis padded to one full MXU K tile


def _round_up(x, m):
    return ((x + m - 1) // m) * m


def _pick_tm(B):
    # M=256 fills the v6e/v7x 2x256x256 MXU, but only take it when the grid
    # still has >= 2 steps so both v7x TensorCores get work.  v5e (4x128x128)
    # is already optimal at M=128.
    if B >= 512:
        return 256
    if B >= 16:
        return min(128, _round_up(B, 8))
    return _round_up(B, 8)


def _make_kernel(C, HW, chunk):
    assert FEAT_DIM % chunk == 0
    n_chunks = FEAT_DIM // chunk

    def kernel(x_ref, w1_ref, b1_ref, w2_ref, b2_ref, o_ref):
        # x_ref: (TM, C*HW) lane-dense input; w1_ref: (KPAD, FEAT) bf16 (scale
        # folded, K zero-padded); w2_ref: (FEAT, EMB) bf16; biases f32.
        tm = o_ref.shape[0]

        # --- global average pool -> zero-padded (TM, KPAD) MXU operand ------
        lane = lax.broadcasted_iota(jnp.int32, (tm, KPAD), 1)
        pooled = jnp.zeros((tm, KPAD), jnp.float32)
        for ci in range(C):
            chan = x_ref[:, ci * HW:(ci + 1) * HW]          # 128-aligned slice
            if chan.dtype != jnp.float32:
                chan = chan.astype(jnp.float32)
            if HW % 256 == 0:                                # VPU half-fold
                half = HW // 2
                chan = chan[:, :half] + chan[:, half:]
            s = jnp.sum(chan, axis=-1, keepdims=True)        # (TM, 1) XLU
            pooled = jnp.where(lane == ci, s, pooled)        # place in lane ci
        pooled_bf = pooled.astype(jnp.bfloat16)              # (TM, KPAD)

        # --- fused chunked projection -> ReLU -> logits accumulation --------
        acc = jnp.zeros((tm, EMB_DIM), jnp.float32)
        for k in range(n_chunks):
            c0 = k * chunk
            feat_c = jnp.dot(pooled_bf, w1_ref[:, c0:c0 + chunk],
                             preferred_element_type=jnp.float32)
            feat_c = jnp.maximum(feat_c + b1_ref[:, c0:c0 + chunk], 0.0)
            acc = acc + jnp.dot(feat_c.astype(jnp.bfloat16),
                                w2_ref[c0:c0 + chunk, :],
                                preferred_element_type=jnp.float32)

        emb = acc + b2_ref[...]                               # (TM, EMB) f32

        # nn.functional.normalize(x, p=2, dim=1): x / max(||x||_2, 1e-12).
        # rsqrt(max(sq, eps^2)) == 1 / max(||x||, eps); epilogue stays f32.
        sq = jnp.sum(emb * emb, axis=-1, keepdims=True)
        inv_norm = lax.rsqrt(jnp.maximum(sq, 1e-24))
        o_ref[...] = (emb * inv_norm).astype(o_ref.dtype)

    return kernel


def facenet_forward(x_nchw, w1, b1, w2, b2):
    B, C, H, W = x_nchw.shape
    HW = H * W

    # NCHW -> (B, C*HW): pure reshape (no transpose, no wrapper-side cast);
    # the whole spatial*channel extent lands densely on the lane axis.
    x = x_nchw.reshape(B, C * HW)

    # Fold the 1/(H*W) mean scale into w1, zero-pad K: C -> KPAD, cast bf16.
    w1_pad = jnp.pad(w1.astype(jnp.float32) / float(HW),
                     ((0, KPAD - C), (0, 0))).astype(jnp.bfloat16)
    w2_bf16 = w2.astype(jnp.bfloat16)
    b1_f32 = b1.reshape(1, FEAT_DIM).astype(jnp.float32)
    b2_f32 = b2.reshape(1, EMB_DIM).astype(jnp.float32)

    TM = _pick_tm(B)
    B_pad = _round_up(B, TM)
    if B_pad != B:
        x = jnp.pad(x, ((0, B_pad - B), (0, 0)))

    # FEAT chunk width: keep the live f32 feat_chunk around ~32 vregs.
    chunk = 256 if TM <= 128 else 128
    grid = (B_pad // TM,)

    out = pl.pallas_call(
        _make_kernel(C, HW, chunk),
        out_shape=jax.ShapeDtypeStruct((B_pad, EMB_DIM), jnp.float32),
        grid_spec=pltpu.PrefetchScalarGridSpec(
            num_scalar_prefetch=0,
            grid=grid,
            in_specs=[
                pl.BlockSpec((TM, C * HW), lambda i: (i, 0)),
                pl.BlockSpec((KPAD, FEAT_DIM), lambda i: (0, 0)),
                pl.BlockSpec((1, FEAT_DIM), lambda i: (0, 0)),
                pl.BlockSpec((FEAT_DIM, EMB_DIM), lambda i: (0, 0)),
                pl.BlockSpec((1, EMB_DIM), lambda i: (0, 0)),
            ],
            out_specs=pl.BlockSpec((TM, EMB_DIM), lambda i: (i, 0)),
        ),
        compiler_params=pltpu.CompilerParams(
            dimension_semantics=("parallel",),
            vmem_limit_bytes=32 * 1024 * 1024,  # fits v5e/v6e (128 MiB) and v7x (64 MiB)
        ),
    )(x, w1_pad, b1_f32, w2_bf16, b2_f32)

    return out[:B]


def facenet_reference(x_nchw, w1, b1, w2, b2):
    # Pure-JAX reference of the same synthetic path (f32 everywhere).
    B, C, H, W = x_nchw.shape
    pooled = jnp.mean(x_nchw.reshape(B, C, H * W).astype(jnp.float32), axis=-1)
    feat = jnp.maximum(pooled @ w1 + b1, 0.0)
    emb = feat @ w2 + b2
    n = jnp.maximum(jnp.linalg.norm(emb, axis=1, keepdims=True), 1e-12)
    return emb / n


def init_params(key, in_channels):
    k1, k2, k3, k4 = jax.random.split(key, 4)
    # Deterministic synthetic weights (no checkpoint loading).
    w1 = jax.random.normal(k1, (in_channels, FEAT_DIM), jnp.float32) * 0.05
    b1 = jax.random.normal(k2, (1, FEAT_DIM), jnp.float32) * 0.01
    w2 = jax.random.normal(k3, (FEAT_DIM, EMB_DIM), jnp.float32) * 0.02
    b2 = jax.random.normal(k4, (1, EMB_DIM), jnp.float32) * 0.01
    return w1, b1, w2, b2


if __name__ == "__main__":
    key = jax.random.PRNGKey(0)
    k_x, k_p = jax.random.split(key)

    # Small NCHW image batch consistent with the module's conv-style input.
    B, C, H, W = 2, 4, 16, 16
    x = jax.random.normal(k_x, (B, C, H, W), jnp.float32)

    w1, b1, w2, b2 = init_params(k_p, C)

    out = facenet_forward(x, w1, b1, w2, b2)
    out = jax.block_until_ready(out)

    # Sanity checks: shape, unit-norm embeddings, and agreement with the
    # pure-JAX reference of the same synthetic path (bf16 MXU tolerance).
    assert out.shape == (B, EMB_DIM), out.shape
    norms = jnp.linalg.norm(out, axis=1)
    assert jnp.allclose(norms, jnp.ones_like(norms), atol=1e-3), norms

    ref = facenet_reference(x, w1, b1, w2, b2)
    assert jnp.allclose(out, ref, atol=2e-2, rtol=2e-2), jnp.max(jnp.abs(out - ref))

    print("KERNEL_OK")
</pallas_src>

<mosaic_0001>
module attributes {stable_mosaic.version = 11 : i64} {
  func.func @kernel(%arg0: i32, %arg1: memref<8x1024xf32, #tpu.memory_space<vmem>>, %arg2: memref<128x1792xbf16, #tpu.memory_space<vmem>>, %arg3: memref<1x1792xf32, #tpu.memory_space<vmem>>, %arg4: memref<1792x128xbf16, #tpu.memory_space<vmem>>, %arg5: memref<1x128xf32, #tpu.memory_space<vmem>>, %arg6: memref<8x128xf32, #tpu.memory_space<vmem>>) attributes {dimension_semantics = [#tpu.dimension_semantics<parallel>], iteration_bounds = array<i64: 1>, scalar_prefetch = 0 : i64, scratch_operands = 0 : i64, tpu.core_type = #tpu.core_type<tc>, window_params = [{transform_indices = @transform_0, window_bounds = array<i64: 8, 1024>}, {pipeline_mode = #tpu.pipeline_mode<synchronous>, transform_indices = @transform_1, window_bounds = array<i64: 128, 1792>}, {pipeline_mode = #tpu.pipeline_mode<synchronous>, transform_indices = @transform_2, window_bounds = array<i64: 1, 1792>}, {pipeline_mode = #tpu.pipeline_mode<synchronous>, transform_indices = @transform_3, window_bounds = array<i64: 1792, 128>}, {pipeline_mode = #tpu.pipeline_mode<synchronous>, transform_indices = @transform_4, window_bounds = array<i64: 1, 128>}, {transform_indices = @transform_5, window_bounds = array<i64: 8, 128>}]} {
    %0 = tpu.iota {dimensions = array<i32: 1>} : vector<8x128xi32>
    %cst = arith.constant 0.000000e+00 : f32
    %1 = vector.broadcast %cst : f32 to vector<8x128xf32>
    %c0 = arith.constant 0 : index
    %c0_0 = arith.constant 0 : index
    %2 = vector.load %arg1[%c0, %c0_0] : memref<8x1024xf32, #tpu.memory_space<vmem>>, vector<8x256xf32>
    %3 = vector.extract_strided_slice %2 {offsets = [0, 0], sizes = [8, 128], strides = [1, 1]} : vector<8x256xf32> to vector<8x128xf32>
    %4 = vector.extract_strided_slice %2 {offsets = [0, 128], sizes = [8, 128], strides = [1, 1]} : vector<8x256xf32> to vector<8x128xf32>
    %5 = arith.addf %3, %4 : vector<8x128xf32>
    %cst_1 = arith.constant dense<0.000000e+00> : vector<8xf32>
    %6 = vector.multi_reduction <add>, %5, %cst_1 [1] : vector<8x128xf32> to vector<8xf32>
    %7 = vector.shape_cast %6 : vector<8xf32> to vector<8x1xf32>
    %c0_i32 = arith.constant 0 : i32
    %8 = vector.broadcast %c0_i32 : i32 to vector<8x128xi32>
    %9 = arith.cmpi eq, %0, %8 : vector<8x128xi32>
    %10 = vector.shape_cast %7 : vector<8x1xf32> to vector<8x1xf32>
    %11 = vector.broadcast %10 : vector<8x1xf32> to vector<8x128xf32>
    %12 = arith.select %9, %11, %1 : vector<8x128xi1>, vector<8x128xf32>
    %c0_2 = arith.constant 0 : index
    %c256 = arith.constant 256 : index
    %13 = vector.load %arg1[%c0_2, %c256] : memref<8x1024xf32, #tpu.memory_space<vmem>>, vector<8x256xf32>
    %14 = vector.extract_strided_slice %13 {offsets = [0, 0], sizes = [8, 128], strides = [1, 1]} : vector<8x256xf32> to vector<8x128xf32>
    %15 = vector.extract_strided_slice %13 {offsets = [0, 128], sizes = [8, 128], strides = [1, 1]} : vector<8x256xf32> to vector<8x128xf32>
    %16 = arith.addf %14, %15 : vector<8x128xf32>
    %cst_3 = arith.constant dense<0.000000e+00> : vector<8xf32>
    %17 = vector.multi_reduction <add>, %16, %cst_3 [1] : vector<8x128xf32> to vector<8xf32>
    %18 = vector.shape_cast %17 : vector<8xf32> to vector<8x1xf32>
    %c1_i32 = arith.constant 1 : i32
    %19 = vector.broadcast %c1_i32 : i32 to vector<8x128xi32>
    %20 = arith.cmpi eq, %0, %19 : vector<8x128xi32>
    %21 = vector.shape_cast %18 : vector<8x1xf32> to vector<8x1xf32>
    %22 = vector.broadcast %21 : vector<8x1xf32> to vector<8x128xf32>
    %23 = arith.select %20, %22, %12 : vector<8x128xi1>, vector<8x128xf32>
    %c0_4 = arith.constant 0 : index
    %c512 = arith.constant 512 : index
    %24 = vector.load %arg1[%c0_4, %c512] : memref<8x1024xf32, #tpu.memory_space<vmem>>, vector<8x256xf32>
    %25 = vector.extract_strided_slice %24 {offsets = [0, 0], sizes = [8, 128], strides = [1, 1]} : vector<8x256xf32> to vector<8x128xf32>
    %26 = vector.extract_strided_slice %24 {offsets = [0, 128], sizes = [8, 128], strides = [1, 1]} : vector<8x256xf32> to vector<8x128xf32>
    %27 = arith.addf %25, %26 : vector<8x128xf32>
    %cst_5 = arith.constant dense<0.000000e+00> : vector<8xf32>
    %28 = vector.multi_reduction <add>, %27, %cst_5 [1] : vector<8x128xf32> to vector<8xf32>
    %29 = vector.shape_cast %28 : vector<8xf32> to vector<8x1xf32>
    %c2_i32 = arith.constant 2 : i32
    %30 = vector.broadcast %c2_i32 : i32 to vector<8x128xi32>
    %31 = arith.cmpi eq, %0, %30 : vector<8x128xi32>
    %32 = vector.shape_cast %29 : vector<8x1xf32> to vector<8x1xf32>
    %33 = vector.broadcast %32 : vector<8x1xf32> to vector<8x128xf32>
    %34 = arith.select %31, %33, %23 : vector<8x128xi1>, vector<8x128xf32>
    %c0_6 = arith.constant 0 : index
    %c768 = arith.constant 768 : index
    %35 = vector.load %arg1[%c0_6, %c768] : memref<8x1024xf32, #tpu.memory_space<vmem>>, vector<8x256xf32>
    %36 = vector.extract_strided_slice %35 {offsets = [0, 0], sizes = [8, 128], strides = [1, 1]} : vector<8x256xf32> to vector<8x128xf32>
    %37 = vector.extract_strided_slice %35 {offsets = [0, 128], sizes = [8, 128], strides = [1, 1]} : vector<8x256xf32> to vector<8x128xf32>
    %38 = arith.addf %36, %37 : vector<8x128xf32>
    %cst_7 = arith.constant dense<0.000000e+00> : vector<8xf32>
    %39 = vector.multi_reduction <add>, %38, %cst_7 [1] : vector<8x128xf32> to vector<8xf32>
    %40 = vector.shape_cast %39 : vector<8xf32> to vector<8x1xf32>
    %c3_i32 = arith.constant 3 : i32
    %41 = vector.broadcast %c3_i32 : i32 to vector<8x128xi32>
    %42 = arith.cmpi eq, %0, %41 : vector<8x128xi32>
    %43 = vector.shape_cast %40 : vector<8x1xf32> to vector<8x1xf32>
    %44 = vector.broadcast %43 : vector<8x1xf32> to vector<8x128xf32>
    %45 = arith.select %42, %44, %34 : vector<8x128xi1>, vector<8x128xf32>
    %46 = arith.truncf %45 : vector<8x128xf32> to vector<8x128xbf16>
    %cst_8 = arith.constant 0.000000e+00 : f32
    %47 = vector.broadcast %cst_8 : f32 to vector<8x128xf32>
    %c0_9 = arith.constant 0 : index
    %c0_10 = arith.constant 0 : index
    %48 = vector.load %arg2[%c0_9, %c0_10] : memref<128x1792xbf16, #tpu.memory_space<vmem>>, vector<128x256xbf16>
    %cst_11 = arith.constant dense<0.000000e+00> : vector<8x256xf32>
    %49 = tpu.matmul %46, %48, %cst_11 {dimension_numbers = #tpu.dot_dimension_numbers<[1], [0], [0], [1], [0, 0, 1, 1], [], []>} : vector<8x128xbf16>, vector<128x256xbf16>, vector<8x256xf32> -> vector<8x256xf32>
    %c0_12 = arith.constant 0 : index
    %c0_13 = arith.constant 0 : index
    %50 = vector.load %arg3[%c0_12, %c0_13] : memref<1x1792xf32, #tpu.memory_space<vmem>>, vector<1x256xf32>
    %51 = vector.broadcast %50 : vector<1x256xf32> to vector<8x256xf32>
    %52 = arith.addf %49, %51 : vector<8x256xf32>
    %cst_14 = arith.constant 0.000000e+00 : f32
    %53 = vector.broadcast %cst_14 : f32 to vector<8x256xf32>
    %54 = arith.maximumf %52, %53 : vector<8x256xf32>
    %55 = arith.truncf %54 : vector<8x256xf32> to vector<8x256xbf16>
    %c0_15 = arith.constant 0 : index
    %c0_16 = arith.constant 0 : index
    %56 = vector.load %arg4[%c0_15, %c0_16] : memref<1792x128xbf16, #tpu.memory_space<vmem>>, vector<256x128xbf16>
    %cst_17 = arith.constant dense<0.000000e+00> : vector<8x128xf32>
    %57 = tpu.matmul %55, %56, %cst_17 {dimension_numbers = #tpu.dot_dimension_numbers<[1], [0], [0], [1], [0, 0, 1, 1], [], []>} : vector<8x256xbf16>, vector<256x128xbf16>, vector<8x128xf32> -> vector<8x128xf32>
    %58 = arith.addf %47, %57 : vector<8x128xf32>
    %c0_18 = arith.constant 0 : index
    %c256_19 = arith.constant 256 : index
    %59 = vector.load %arg2[%c0_18, %c256_19] : memref<128x1792xbf16, #tpu.memory_space<vmem>>, vector<128x256xbf16>
    %cst_20 = arith.constant dense<0.000000e+00> : vector<8x256xf32>
    %60 = tpu.matmul %46, %59, %cst_20 {dimension_numbers = #tpu.dot_dimension_numbers<[1], [0], [0], [1], [0, 0, 1, 1], [], []>} : vector<8x128xbf16>, vector<128x256xbf16>, vector<8x256xf32> -> vector<8x256xf32>
    %c0_21 = arith.constant 0 : index
    %c256_22 = arith.constant 256 : index
    %61 = vector.load %arg3[%c0_21, %c256_22] : memref<1x1792xf32, #tpu.memory_space<vmem>>, vector<1x256xf32>
    %62 = vector.broadcast %61 : vector<1x256xf32> to vector<8x256xf32>
    %63 = arith.addf %60, %62 : vector<8x256xf32>
    %cst_23 = arith.constant 0.000000e+00 : f32
    %64 = vector.broadcast %cst_23 : f32 to vector<8x256xf32>
    %65 = arith.maximumf %63, %64 : vector<8x256xf32>
    %66 = arith.truncf %65 : vector<8x256xf32> to vector<8x256xbf16>
    %c256_24 = arith.constant 256 : index
    %c0_25 = arith.constant 0 : index
    %67 = vector.load %arg4[%c256_24, %c0_25] : memref<1792x128xbf16, #tpu.memory_space<vmem>>, vector<256x128xbf16>
    %cst_26 = arith.constant dense<0.000000e+00> : vector<8x128xf32>
    %68 = tpu.matmul %66, %67, %cst_26 {dimension_numbers = #tpu.dot_dimension_numbers<[1], [0], [0], [1], [0, 0, 1, 1], [], []>} : vector<8x256xbf16>, vector<256x128xbf16>, vector<8x128xf32> -> vector<8x128xf32>
    %69 = arith.addf %58, %68 : vector<8x128xf32>
    %c0_27 = arith.constant 0 : index
    %c512_28 = arith.constant 512 : index
    %70 = vector.load %arg2[%c0_27, %c512_28] : memref<128x1792xbf16, #tpu.memory_space<vmem>>, vector<128x256xbf16>
    %cst_29 = arith.constant dense<0.000000e+00> : vector<8x256xf32>
    %71 = tpu.matmul %46, %70, %cst_29 {dimension_numbers = #tpu.dot_dimension_numbers<[1], [0], [0], [1], [0, 0, 1, 1], [], []>} : vector<8x128xbf16>, vector<128x256xbf16>, vector<8x256xf32> -> vector<8x256xf32>
    %c0_30 = arith.constant 0 : index
    %c512_31 = arith.constant 512 : index
    %72 = vector.load %arg3[%c0_30, %c512_31] : memref<1x1792xf32, #tpu.memory_space<vmem>>, vector<1x256xf32>
    %73 = vector.broadcast %72 : vector<1x256xf32> to vector<8x256xf32>
    %74 = arith.addf %71, %73 : vector<8x256xf32>
    %cst_32 = arith.constant 0.000000e+00 : f32
    %75 = vector.broadcast %cst_32 : f32 to vector<8x256xf32>
    %76 = arith.maximumf %74, %75 : vector<8x256xf32>
    %77 = arith.truncf %76 : vector<8x256xf32> to vector<8x256xbf16>
    %c512_33 = arith.constant 512 : index
    %c0_34 = arith.constant 0 : index
    %78 = vector.load %arg4[%c512_33, %c0_34] : memref<1792x128xbf16, #tpu.memory_space<vmem>>, vector<256x128xbf16>
    %cst_35 = arith.constant dense<0.000000e+00> : vector<8x128xf32>
    %79 = tpu.matmul %77, %78, %cst_35 {dimension_numbers = #tpu.dot_dimension_numbers<[1], [0], [0], [1], [0, 0, 1, 1], [], []>} : vector<8x256xbf16>, vector<256x128xbf16>, vector<8x128xf32> -> vector<8x128xf32>
    %80 = arith.addf %69, %79 : vector<8x128xf32>
    %c0_36 = arith.constant 0 : index
    %c768_37 = arith.constant 768 : index
    %81 = vector.load %arg2[%c0_36, %c768_37] : memref<128x1792xbf16, #tpu.memory_space<vmem>>, vector<128x256xbf16>
    %cst_38 = arith.constant dense<0.000000e+00> : vector<8x256xf32>
    %82 = tpu.matmul %46, %81, %cst_38 {dimension_numbers = #tpu.dot_dimension_numbers<[1], [0], [0], [1], [0, 0, 1, 1], [], []>} : vector<8x128xbf16>, vector<128x256xbf16>, vector<8x256xf32> -> vector<8x256xf32>
    %c0_39 = arith.constant 0 : index
    %c768_40 = arith.constant 768 : index
    %83 = vector.load %arg3[%c0_39, %c768_40] : memref<1x1792xf32, #tpu.memory_space<vmem>>, vector<1x256xf32>
    %84 = vector.broadcast %83 : vector<1x256xf32> to vector<8x256xf32>
    %85 = arith.addf %82, %84 : vector<8x256xf32>
    %cst_41 = arith.constant 0.000000e+00 : f32
    %86 = vector.broadcast %cst_41 : f32 to vector<8x256xf32>
    %87 = arith.maximumf %85, %86 : vector<8x256xf32>
    %88 = arith.truncf %87 : vector<8x256xf32> to vector<8x256xbf16>
    %c768_42 = arith.constant 768 : index
    %c0_43 = arith.constant 0 : index
    %89 = vector.load %arg4[%c768_42, %c0_43] : memref<1792x128xbf16, #tpu.memory_space<vmem>>, vector<256x128xbf16>
    %cst_44 = arith.constant dense<0.000000e+00> : vector<8x128xf32>
    %90 = tpu.matmul %88, %89, %cst_44 {dimension_numbers = #tpu.dot_dimension_numbers<[1], [0], [0], [1], [0, 0, 1, 1], [], []>} : vector<8x256xbf16>, vector<256x128xbf16>, vector<8x128xf32> -> vector<8x128xf32>
    %91 = arith.addf %80, %90 : vector<8x128xf32>
    %c0_45 = arith.constant 0 : index
    %c1024 = arith.constant 1024 : index
    %92 = vector.load %arg2[%c0_45, %c1024] : memref<128x1792xbf16, #tpu.memory_space<vmem>>, vector<128x256xbf16>
    %cst_46 = arith.constant dense<0.000000e+00> : vector<8x256xf32>
    %93 = tpu.matmul %46, %92, %cst_46 {dimension_numbers = #tpu.dot_dimension_numbers<[1], [0], [0], [1], [0, 0, 1, 1], [], []>} : vector<8x128xbf16>, vector<128x256xbf16>, vector<8x256xf32> -> vector<8x256xf32>
    %c0_47 = arith.constant 0 : index
    %c1024_48 = arith.constant 1024 : index
    %94 = vector.load %arg3[%c0_47, %c1024_48] : memref<1x1792xf32, #tpu.memory_space<vmem>>, vector<1x256xf32>
    %95 = vector.broadcast %94 : vector<1x256xf32> to vector<8x256xf32>
    %96 = arith.addf %93, %95 : vector<8x256xf32>
    %cst_49 = arith.constant 0.000000e+00 : f32
    %97 = vector.broadcast %cst_49 : f32 to vector<8x256xf32>
    %98 = arith.maximumf %96, %97 : vector<8x256xf32>
    %99 = arith.truncf %98 : vector<8x256xf32> to vector<8x256xbf16>
    %c1024_50 = arith.constant 1024 : index
    %c0_51 = arith.constant 0 : index
    %100 = vector.load %arg4[%c1024_50, %c0_51] : memref<1792x128xbf16, #tpu.memory_space<vmem>>, vector<256x128xbf16>
    %cst_52 = arith.constant dense<0.000000e+00> : vector<8x128xf32>
    %101 = tpu.matmul %99, %100, %cst_52 {dimension_numbers = #tpu.dot_dimension_numbers<[1], [0], [0], [1], [0, 0, 1, 1], [], []>} : vector<8x256xbf16>, vector<256x128xbf16>, vector<8x128xf32> -> vector<8x128xf32>
    %102 = arith.addf %91, %101 : vector<8x128xf32>
    %c0_53 = arith.constant 0 : index
    %c1280 = arith.constant 1280 : index
    %103 = vector.load %arg2[%c0_53, %c1280] : memref<128x1792xbf16, #tpu.memory_space<vmem>>, vector<128x256xbf16>
    %cst_54 = arith.constant dense<0.000000e+00> : vector<8x256xf32>
    %104 = tpu.matmul %46, %103, %cst_54 {dimension_numbers = #tpu.dot_dimension_numbers<[1], [0], [0], [1], [0, 0, 1, 1], [], []>} : vector<8x128xbf16>, vector<128x256xbf16>, vector<8x256xf32> -> vector<8x256xf32>
    %c0_55 = arith.constant 0 : index
    %c1280_56 = arith.constant 1280 : index
    %105 = vector.load %arg3[%c0_55, %c1280_56] : memref<1x1792xf32, #tpu.memory_space<vmem>>, vector<1x256xf32>
    %106 = vector.broadcast %105 : vector<1x256xf32> to vector<8x256xf32>
    %107 = arith.addf %104, %106 : vector<8x256xf32>
    %cst_57 = arith.constant 0.000000e+00 : f32
    %108 = vector.broadcast %cst_57 : f32 to vector<8x256xf32>
    %109 = arith.maximumf %107, %108 : vector<8x256xf32>
    %110 = arith.truncf %109 : vector<8x256xf32> to vector<8x256xbf16>
    %c1280_58 = arith.constant 1280 : index
    %c0_59 = arith.constant 0 : index
    %111 = vector.load %arg4[%c1280_58, %c0_59] : memref<1792x128xbf16, #tpu.memory_space<vmem>>, vector<256x128xbf16>
    %cst_60 = arith.constant dense<0.000000e+00> : vector<8x128xf32>
    %112 = tpu.matmul %110, %111, %cst_60 {dimension_numbers = #tpu.dot_dimension_numbers<[1], [0], [0], [1], [0, 0, 1, 1], [], []>} : vector<8x256xbf16>, vector<256x128xbf16>, vector<8x128xf32> -> vector<8x128xf32>
    %113 = arith.addf %102, %112 : vector<8x128xf32>
    %c0_61 = arith.constant 0 : index
    %c1536 = arith.constant 1536 : index
    %114 = vector.load %arg2[%c0_61, %c1536] : memref<128x1792xbf16, #tpu.memory_space<vmem>>, vector<128x256xbf16>
    %cst_62 = arith.constant dense<0.000000e+00> : vector<8x256xf32>
    %115 = tpu.matmul %46, %114, %cst_62 {dimension_numbers = #tpu.dot_dimension_numbers<[1], [0], [0], [1], [0, 0, 1, 1], [], []>} : vector<8x128xbf16>, vector<128x256xbf16>, vector<8x256xf32> -> vector<8x256xf32>
    %c0_63 = arith.constant 0 : index
    %c1536_64 = arith.constant 1536 : index
    %116 = vector.load %arg3[%c0_63, %c1536_64] : memref<1x1792xf32, #tpu.memory_space<vmem>>, vector<1x256xf32>
    %117 = vector.broadcast %116 : vector<1x256xf32> to vector<8x256xf32>
    %118 = arith.addf %115, %117 : vector<8x256xf32>
    %cst_65 = arith.constant 0.000000e+00 : f32
    %119 = vector.broadcast %cst_65 : f32 to vector<8x256xf32>
    %120 = arith.maximumf %118, %119 : vector<8x256xf32>
    %121 = arith.truncf %120 : vector<8x256xf32> to vector<8x256xbf16>
    %c1536_66 = arith.constant 1536 : index
    %c0_67 = arith.constant 0 : index
    %122 = vector.load %arg4[%c1536_66, %c0_67] : memref<1792x128xbf16, #tpu.memory_space<vmem>>, vector<256x128xbf16>
    %cst_68 = arith.constant dense<0.000000e+00> : vector<8x128xf32>
    %123 = tpu.matmul %121, %122, %cst_68 {dimension_numbers = #tpu.dot_dimension_numbers<[1], [0], [0], [1], [0, 0, 1, 1], [], []>} : vector<8x256xbf16>, vector<256x128xbf16>, vector<8x128xf32> -> vector<8x128xf32>
    %124 = arith.addf %113, %123 : vector<8x128xf32>
    %c0_69 = arith.constant 0 : index
    %c0_70 = arith.constant 0 : index
    %125 = vector.load %arg5[%c0_69, %c0_70] : memref<1x128xf32, #tpu.memory_space<vmem>>, vector<1x128xf32>
    %126 = vector.broadcast %125 : vector<1x128xf32> to vector<8x128xf32>
    %127 = arith.addf %124, %126 : vector<8x128xf32>
    %128 = arith.mulf %127, %127 : vector<8x128xf32>
    %cst_71 = arith.constant dense<0.000000e+00> : vector<8xf32>
    %129 = vector.multi_reduction <add>, %128, %cst_71 [1] : vector<8x128xf32> to vector<8xf32>
    %130 = vector.shape_cast %129 : vector<8xf32> to vector<8x1xf32>
    %cst_72 = arith.constant 1.000000e-24 : f32
    %131 = vector.broadcast %cst_72 : f32 to vector<8x1xf32>
    %132 = arith.maximumf %130, %131 : vector<8x1xf32>
    %133 = math.rsqrt %132 : vector<8x1xf32>
    %134 = vector.broadcast %133 : vector<8x1xf32> to vector<8x128xf32>
    %135 = arith.mulf %127, %134 : vector<8x128xf32>
    %c0_73 = arith.constant 0 : index
    %c0_74 = arith.constant 0 : index
    %136 = vector.load %arg6[%c0_73, %c0_74] : memref<8x128xf32, #tpu.memory_space<vmem>>, vector<8x128xf32>
    tpu.vector_store %arg6[%c0_73, %c0_74], %135 {strides = array<i32>} : memref<8x128xf32, #tpu.memory_space<vmem>>, vector<8x128xf32>,
    return
  }
  func.func @transform_0(%arg0: i32) -> (i32, i32) {
    %c0_i32 = arith.constant 0 : i32
    %c0_i32_0 = arith.constant 0 : i32
    return %arg0, %c0_i32 : i32, i32
  }
  func.func @transform_1(%arg0: i32) -> (i32, i32) {
    %c0_i32 = arith.constant 0 : i32
    %c0_i32_0 = arith.constant 0 : i32
    %c0_i32_1 = arith.constant 0 : i32
    return %c0_i32, %c0_i32_0 : i32, i32
  }
  func.func @transform_2(%arg0: i32) -> (i32, i32) {
    %c0_i32 = arith.constant 0 : i32
    %c0_i32_0 = arith.constant 0 : i32
    %c0_i32_1 = arith.constant 0 : i32
    return %c0_i32, %c0_i32_0 : i32, i32
  }
  func.func @transform_3(%arg0: i32) -> (i32, i32) {
    %c0_i32 = arith.constant 0 : i32
    %c0_i32_0 = arith.constant 0 : i32
    %c0_i32_1 = arith.constant 0 : i32
    return %c0_i32, %c0_i32_0 : i32, i32
  }
  func.func @transform_4(%arg0: i32) -> (i32, i32) {
    %c0_i32 = arith.constant 0 : i32
    %c0_i32_0 = arith.constant 0 : i32
    %c0_i32_1 = arith.constant 0 : i32
    return %c0_i32, %c0_i32_0 : i32, i32
  }
  func.func @transform_5(%arg0: i32) -> (i32, i32) {
    %c0_i32 = arith.constant 0 : i32
    %c0_i32_0 = arith.constant 0 : i32
    return %arg0, %c0_i32 : i32, i32
  }
}

</mosaic_0001>

<bundles_post_ra>
// kernel: tpu_custom_call.1
= control target key start
LH: loop header
LB: loop body
LE: loop exit
PB: predicated region body
PF: predicated region fallthrough
CT: control target
= control target key end

     0   :  { %10 = vsyncpa [#allocation3], 0  ;;  %s3319_s0 = inlined_call_operand.hbm [shape: f32[8,1024], index: 0, kind: input, shape index: {}]   ;;  %s3320_s1 = inlined_call_operand.hbm [shape: bf16[128,1792], index: 1, kind: input, shape index: {}]   ;;  %s3321_s2 = inlined_call_operand.hbm [shape: f32[1,1792], index: 2, kind: input, shape index: {}]   ;;  %s3322_s3 = inlined_call_operand.hbm [shape: bf16[1792,128], index: 3, kind: input, shape index: {}]   ;;  %s3323_s4 = inlined_call_operand.vmem [shape: f32[1,128], index: 4, kind: input, shape index: {}]   ;;  %s3324_s5 = inlined_call_operand.hbm [shape: f32[8,128], index: 5, kind: output, shape index: {}]  }
   0x1   :  { %11 = vsyncpa [#allocation6], 0 }
   0x2   :  { %12 = vsyncpa [#allocation9], 0 }
   0x3   :  { %13 = vsyncpa [#allocation4], 0  ;;  %s3177_s18 = smov [#allocation5]   ;;  %s3059_s22 = scalar_lea.hbm %s3320_s1, 14336 }
   0x4   :  { %s29_s19 = sshll.u32 %s3177_s18, 4  ;;  %p3060_p0 = scmp.ne.s32.totalorder %s3320_s1, %s3059_s22  ;;  %s30_s19 = int_to_ptr.vmem [resolvable:$true] %s29_s19 }
   0x5   :  { %p3063_p1 = scmp.lt.u32.totalorder %s3059_s22, %s3320_s1 }
   0x7   :  { %p3065_p2 = pnand %p3063_p1, %p3060_p0 }
   0x9   :  { %3068 = shalt.err (!%p3065_p2)
}
   0xa   :  { %s3069_s27 = scalar_lea.vmem %s30_s19, 14336  ;;  %p3074_p4 = scmp.lt.s32.totalorder %s30_s19, %s30_s19 }
   0xb   :  { %p3070_p3 = scmp.ne.s32.totalorder %s30_s19, %s3069_s27  ;;  %p3075_p5 = scmp.lt.s32.totalorder %s3069_s27, %s3069_s27 }
   0xd   :  { %p3076_p6 = por %p3075_p5, %p3074_p4 }
   0xf   :  { %p3077_p7 = pnand %p3076_p6, %p3070_p3 }
  0x11   :  { %3080 = shalt.err (!%p3077_p7)
}
  0x12   :  { %s3178_s28 = smov 896   ;;  %s3179_s29 = smov 56  }
  0x13   :  { %35 = dma.hbm_to_vmem [thread:$0]  %s3320_s1, 14336, %s30_s19, [#allocation6], %s3178_s28, %s3178_s28, %s3179_s29  }
  0x14   :  { %s3180_s7 = smov [#allocation2]   ;;  %s3181_s9 = smov [#allocation7]  }
  0x15   :  { %s20_s8 = sshll.u32 %s3180_s7, 4  ;;  %s42_s10 = sshll.u32 %s3181_s9, 4  ;;  %s21_s8 = int_to_ptr.vmem [resolvable:$true] %s20_s8  ;;  %s43_s10 = int_to_ptr.vmem [resolvable:$true] %s42_s10 }
  0x16   :  { %s3081_s13 = scalar_lea.hbm %s3319_s0, 1024 }
  0x17   :  { %p3082_p8 = scmp.ne.s32.totalorder %s3319_s0, %s3081_s13  ;;  %p3085_p9 = scmp.lt.u32.totalorder %s3081_s13, %s3319_s0 }
  0x19   :  { %p3087_p10 = pnand %p3085_p9, %p3082_p8 }
  0x1b   :  { %3090 = shalt.err (!%p3087_p10)
}
  0x1c   :  { %s3091_s1 = scalar_lea.vmem %s21_s8, 1024  ;;  %p3096_p12 = scmp.lt.s32.totalorder %s21_s8, %s21_s8 }
  0x1d   :  { %p3092_p11 = scmp.ne.s32.totalorder %s21_s8, %s3091_s1  ;;  %p3097_p13 = scmp.lt.s32.totalorder %s3091_s1, %s3091_s1 }
  0x1f   :  { %p3098_p0 = por %p3097_p13, %p3096_p12 }
  0x21   :  { %p3099_p1 = pnand %p3098_p0, %p3092_p11 }
  0x23   :  { %3102 = shalt.err (!%p3099_p1)
}
  0x24   :  { %23 = dma.hbm_to_vmem [thread:$0]  %s3319_s0, 1024, %s21_s8, [#allocation3]  }
  0x25   :  { %s3103_s22 = scalar_lea.hbm %s3321_s2, 224 }
  0x26   :  { %p3104_p2 = scmp.ne.s32.totalorder %s3321_s2, %s3103_s22  ;;  %p3107_p3 = scmp.lt.u32.totalorder %s3103_s22, %s3321_s2 }
  0x28   :  { %p3109_p4 = pnand %p3107_p3, %p3104_p2 }
  0x2a   :  { %3112 = shalt.err (!%p3109_p4)
}
  0x2b   :  { %s3113_s27 = scalar_lea.vmem %s43_s10, 224  ;;  %p3118_p6 = scmp.lt.s32.totalorder %s43_s10, %s43_s10 }
  0x2c   :  { %p3114_p5 = scmp.ne.s32.totalorder %s43_s10, %s3113_s27  ;;  %p3119_p7 = scmp.lt.s32.totalorder %s3113_s27, %s3113_s27 }
  0x2e   :  { %p3120_p8 = por %p3119_p7, %p3118_p6 }
  0x30   :  { %p3121_p9 = pnand %p3120_p8, %p3114_p5 }
  0x32   :  { %3124 = shalt.err (!%p3121_p9)
}
  0x33   :  { %45 = dma.hbm_to_vmem [thread:$0]  %s3321_s2, 224, %s43_s10, [#allocation6]  }
  0x34   :  { %s3182_s29 = smov [#allocation8]   ;;  %s3125_s8 = scalar_lea.hbm %s3322_s3, 14336 }
  0x35   :  { %s51_s30 = sshll.u32 %s3182_s29, 4  ;;  %p3126_p10 = scmp.ne.s32.totalorder %s3322_s3, %s3125_s8  ;;  %s52_s30 = int_to_ptr.vmem [resolvable:$true] %s51_s30 }
  0x36   :  { %p3129_p11 = scmp.lt.u32.totalorder %s3125_s8, %s3322_s3 }
  0x38   :  { %p3131_p12 = pnand %p3129_p11, %p3126_p10 }
  0x3a   :  { %3134 = shalt.err (!%p3131_p12)
}
  0x3b   :  { %s3135_s14 = scalar_lea.vmem %s52_s30, 14336  ;;  %p3140_p0 = scmp.lt.s32.totalorder %s52_s30, %s52_s30 }
  0x3c   :  { %p3136_p13 = scmp.ne.s32.totalorder %s52_s30, %s3135_s14  ;;  %p3141_p1 = scmp.lt.s32.totalorder %s3135_s14, %s3135_s14 }
  0x3e   :  { %p3142_p2 = por %p3141_p1, %p3140_p0 }
  0x40   :  { %p3143_p3 = pnand %p3142_p2, %p3136_p13 }
  0x42   :  { %3146 = shalt.err (!%p3143_p3)
}
  0x43   :  { %s3183_s2 = smov 64   ;;  %s3184_s10 = smov 4  }
  0x44   :  { %57 = dma.hbm_to_vmem [thread:$0]  %s3322_s3, 14336, %s52_s30, [#allocation9], %s3183_s2, %s3183_s2, %s3184_s10  }
  0x45   :  { %3169 = dma.done.wait [#allocation3], 1024  }
  0x46   :  { %3170 = vsyncadd [#allocation3], 4294966272 }
  0x47   :  { %3171 = dma.done.wait [#allocation6], 14560  }
  0x48   :  { %3172 = vsyncadd [#allocation6], 4294952736 }
  0x49   :  { %3173 = dma.done.wait [#allocation9], 14336  }
  0x4a   :  { %3174 = vsyncadd [#allocation9], 4294952960  ;;  %v75_v0 = vld [vmem:[#allocation2] sm:$0xff]  ;;  %v76_v1 = vld [vmem:[#allocation2 + $0x8] sm:$0xff]  ;;  %v3185_v38 = vmov 0   ;;  %v73_v47 = vlaneseq  ;;  %s3186_s1 = smov [#allocation10]  }
  0x4b   :  { %v89_v2 = vld [vmem:[#allocation2 + $0x20] sm:$0xff]  ;;  %v77_v3 = vadd.f32 %v76_v1, %v75_v0  ;;  %v90_v4 = vld [vmem:[#allocation2 + $0x28] sm:$0xff]  ;;  %v82_v5 = vld [vmem:[#allocation2 + $0x10] sm:$0xff]  ;;  %244 = vmatprep.mubr.bf16.mxu0 %v3185_v38  ;;  %429 = vmatprep.mubr.bf16.mxu1 %v3185_v38  ;;  %s2377_s18 = sshll.u32 %s3186_s1, 4  ;;  %s2378_s18 = int_to_ptr.vmem [resolvable:$true] %s2377_s18 }
  0x4c   :  { %v83_v6 = vld [vmem:[#allocation2 + $0x18] sm:$0xff]  ;;  %v91_v7 = vadd.f32 %v90_v4, %v89_v2  ;;  %v96_v8 = vld [vmem:[#allocation2 + $0x30] sm:$0xff]  ;;  %v2779_v13 = vld [vmem:[#allocation5 + $0xc] ss:$56 sps:$4 sm:$0xff]   ;;  %v74_v48 = vand.u32 127, %v73_v47  ;;  %s3147_s19 = scalar_lea.vmem %s2378_s18, 128  ;;  %p3152_p5 = scmp.lt.s32.totalorder %s2378_s18, %s2378_s18 }
  0x4d   :  { %v97_v9 = vld [vmem:[#allocation2 + $0x38] sm:$0xff]  ;;  %78 = vadd.xlane.f32.xlu0 %v77_v3  ;;  %v84_v10 = vadd.f32 %v83_v6, %v82_v5  ;;  %v2782_v15 = vld [vmem:[#allocation5 + $0x8] ss:$56 sps:$4 sm:$0xff]   ;;  %397 = vmatprep.subr.bf16.mxu1 %v2779_v13  ;;  %v2783_v16 = vld [vmem:[#allocation5 + $0x74] ss:$56 sps:$4 sm:$0xff]   ;;  %p3148_p4 = scmp.ne.s32.totalorder %s2378_s18, %s3147_s19  ;;  %p3153_p6 = scmp.lt.s32.totalorder %s3147_s19, %s3147_s19 }
  0x4e   :  { %v2777_v11 = vld [vmem:[#allocation5 + $0x4] ss:$56 sps:$4 sm:$0xff]   ;;  %92 = vadd.xlane.f32.xlu1 %v91_v7  ;;  %v98_v12 = vadd.f32 %v97_v9, %v96_v8  ;;  %v2781_v14 = vld [vmem:[#allocation5] ss:$56 sps:$4 sm:$0xff]   ;;  %398 = vmatpush1.bf16.msra.mxu1 %v2782_v15  ;;  %v2787_v18 = vld [vmem:[#allocation5 + $0x70] ss:$56 sps:$4 sm:$0xff]  }
  0x4f   :  { %212 = vmatprep.subr.bf16.mxu0 %v2777_v11  ;;  %v2785_v17 = vld [vmem:[#allocation5 + $0x7c] ss:$56 sps:$4 sm:$0xff]   ;;  %v2788_v19 = vld [vmem:[#allocation5 + $0x78] ss:$56 sps:$4 sm:$0xff]   ;;  %v2791_v21 = vld [vmem:[#allocation5 + $0xec] ss:$56 sps:$4 sm:$0xff]   ;;  %p3154_p7 = por %p3153_p6, %p3152_p5 }
  0x50   :  { %213 = vmatpush1.bf16.msra.mxu0 %v2781_v14  ;;  %v2789_v20 = vld [vmem:[#allocation5 + $0xe4] ss:$56 sps:$4 sm:$0xff]   ;;  %399 = vmatprep.subr.bf16.mxu1 %v2785_v17  ;;  %v2793_v22 = vld [vmem:[#allocation5 + $0xe0] ss:$56 sps:$4 sm:$0xff]   ;;  %v2795_v24 = vld [vmem:[#allocation5 + $0x154] ss:$56 sps:$4 sm:$0xff]  }
  0x51   :  { %85 = vadd.xlane.f32.xlu0 %v84_v10  ;;  %214 = vmatprep.subr.bf16.mxu0 %v2783_v16  ;;  %v2794_v23 = vld [vmem:[#allocation5 + $0xe8] ss:$56 sps:$4 sm:$0xff]   ;;  %v2797_v25 = vld [vmem:[#allocation5 + $0x15c] ss:$56 sps:$4 sm:$0xff]   ;;  %v2800_v27 = vld [vmem:[#allocation5 + $0x158] ss:$56 sps:$4 sm:$0xff]   ;;  %p3155_p8 = pnand %p3154_p7, %p3148_p4 }
  0x52   :  { %99 = vadd.xlane.f32.xlu1 %v98_v12  ;;  %400 = vmatpush1.bf16.msra.mxu1 %v2788_v19  ;;  %v2799_v26 = vld [vmem:[#allocation5 + $0x150] ss:$56 sps:$4 sm:$0xff]   ;;  %v2801_v28 = vld [vmem:[#allocation5 + $0x1c4] ss:$56 sps:$4 sm:$0xff]   ;;  %v2805_v30 = vld [vmem:[#allocation5 + $0x1c0] ss:$56 sps:$4 sm:$0xff]  }
  0x53   :  { %401 = vmatprep.subr.bf16.mxu1 %v2791_v21  ;;  %v2803_v29 = vld [vmem:[#allocation5 + $0x1cc] ss:$56 sps:$4 sm:$0xff]   ;;  %v2806_v31 = vld [vmem:[#allocation5 + $0x1c8] ss:$56 sps:$4 sm:$0xff]   ;;  %v2809_v33 = vld [vmem:[#allocation5 + $0x23c] ss:$56 sps:$4 sm:$0xff]  }
  0x54   :  { %215 = vmatpush1.bf16.msra.mxu0 %v2787_v18  ;;  %v2807_v32 = vld [vmem:[#allocation5 + $0x234] ss:$56 sps:$4 sm:$0xff]   ;;  %v2811_v34 = vld [vmem:[#allocation5 + $0x230] ss:$56 sps:$4 sm:$0xff]   ;;  %v2813_v36 = vld [vmem:[#allocation5 + $0x2a4] ss:$56 sps:$4 sm:$0xff]  }
  0x55   :  { %216 = vmatprep.subr.bf16.mxu0 %v2789_v20  ;;  %v2812_v35 = vld [vmem:[#allocation5 + $0x238] ss:$56 sps:$4 sm:$0xff]   ;;  %v2815_v37 = vld [vmem:[#allocation5 + $0x2ac] ss:$56 sps:$4 sm:$0xff]   ;;  %v2818_v40 = vld [vmem:[#allocation5 + $0x2a8] ss:$56 sps:$4 sm:$0xff]  }
  0x56   :  { %402 = vmatpush1.bf16.msra.mxu1 %v2794_v23  ;;  %v2817_v39 = vld [vmem:[#allocation5 + $0x2a0] ss:$56 sps:$4 sm:$0xff]   ;;  %v2819_v41 = vld [vmem:[#allocation5 + $0x314] ss:$56 sps:$4 sm:$0xff]   ;;  %v2823_v43 = vld [vmem:[#allocation5 + $0x310] ss:$56 sps:$4 sm:$0xff]  }
  0x57   :  { %403 = vmatprep.subr.bf16.mxu1 %v2797_v25  ;;  %v2821_v42 = vld [vmem:[#allocation5 + $0x31c] ss:$56 sps:$4 sm:$0xff]   ;;  %v2824_v44 = vld [vmem:[#allocation5 + $0x318] ss:$56 sps:$4 sm:$0xff]   ;;  %vm80_vm0 = vcmp.eq.s32.totalorder %v74_v48, 0  ;;  %vm87_vm1 = vcmp.eq.s32.totalorder %v74_v48, 1 }
  0x58   :  { %217 = vmatpush1.bf16.msra.mxu0 %v2793_v22  ;;  %v2825_v45 = vld [vmem:[#allocation8 + $0xc0] sm:$0xff]   ;;  %vm94_vm2 = vcmp.eq.s32.totalorder %v74_v48, 2  ;;  %vm101_vm3 = vcmp.eq.s32.totalorder %v74_v48, 3  ;;  %v2829_v60 = vld [vmem:[#allocation8 + $0xc8] sm:$0xff]   ;;  %v2833_v0 = vld [vmem:[#allocation8 + $0xd0] sm:$0xff]   ;;  %v123_v25 = vshrl.u32 %v73_v47, 7 }
  0x59   :  { %218 = vmatprep.subr.bf16.mxu0 %v2795_v24  ;;  %v2827_v46 = vld [vmem:[#allocation8 + $0x40] sm:$0xff]   ;;  %v2831_v61 = vld [vmem:[#allocation8 + $0x48] sm:$0xff]   ;;  %v2835_v1 = vld [vmem:[#allocation8 + $0x50] sm:$0xff]  }
  0x5a   :  { %404 = vmatpush1.bf16.msra.mxu1 %v2800_v27  ;;  %v2826_v57 = vld [vmem:[#allocation8 + $0x80] sm:$0xff]   ;;  %v2830_v62 = vld [vmem:[#allocation8 + $0x88] sm:$0xff]   ;;  %v2834_v2 = vld [vmem:[#allocation8 + $0x90] sm:$0xff]   ;;  %v3275_v27 = vsub.s32 1, %v123_v25 }
  0x5b   :  { %405 = vmatprep.subr.bf16.mxu1 %v2803_v29  ;;  %v2828_v58 = vld [vmem:[#allocation8] sm:$0xff]   ;;  %v2832_v63 = vld [vmem:[#allocation8 + $0x8] sm:$0xff]   ;;  %v2836_v3 = vld [vmem:[#allocation8 + $0x10] sm:$0xff]  }
  0x5c   :  { %219 = vmatpush1.bf16.msra.mxu0 %v2799_v26  ;;  %v2837_v4 = vld [vmem:[#allocation8 + $0xd8] sm:$0xff]   ;;  %v2841_v8 = vld [vmem:[#allocation8 + $0xe0] sm:$0xff]   ;;  %v2845_v12 = vld [vmem:[#allocation8 + $0xe8] sm:$0xff]   ;;  %v3273_v26 = vsub.s32 0, %v123_v25 }
  0x5d   :  { %220 = vmatprep.subr.bf16.mxu0 %v2801_v28  ;;  %v2839_v5 = vld [vmem:[#allocation8 + $0x58] sm:$0xff]   ;;  %v2843_v9 = vld [vmem:[#allocation8 + $0x60] sm:$0xff]   ;;  %v2847_v13 = vld [vmem:[#allocation8 + $0x68] sm:$0xff]  }
  0x5e   :  { %406 = vmatpush1.bf16.msra.mxu1 %v2806_v31  ;;  %v2838_v6 = vld [vmem:[#allocation8 + $0x98] sm:$0xff]   ;;  %v2842_v10 = vld [vmem:[#allocation8 + $0xa0] sm:$0xff]   ;;  %v2846_v14 = vld [vmem:[#allocation8 + $0xa8] sm:$0xff]  }
  0x5f   :  { %407 = vmatprep.subr.bf16.mxu1 %v2809_v33  ;;  %v2840_v7 = vld [vmem:[#allocation8 + $0x18] sm:$0xff]   ;;  %v2844_v11 = vld [vmem:[#allocation8 + $0x20] sm:$0xff]   ;;  %v2848_v15 = vld [vmem:[#allocation8 + $0x28] sm:$0xff]  }
  0x60   :  { %221 = vmatpush1.bf16.msra.mxu0 %v2805_v30  ;;  %v2849_v16 = vld [vmem:[#allocation8 + $0xf0] sm:$0xff]   ;;  %v2853_v20 = vld [vmem:[#allocation8 + $0xf8] sm:$0xff]  }
  0x61   :  { %222 = vmatprep.subr.bf16.mxu0 %v2807_v32  ;;  %v2850_v17 = vld [vmem:[#allocation8 + $0xb0] sm:$0xff]   ;;  %v2854_v21 = vld [vmem:[#allocation8 + $0xb8] sm:$0xff]  }
  0x62   :  { %408 = vmatpush1.bf16.msra.mxu1 %v2812_v35  ;;  %v2851_v18 = vld [vmem:[#allocation8 + $0x70] sm:$0xff]   ;;  %v2855_v22 = vld [vmem:[#allocation8 + $0x78] sm:$0xff]  }
  0x63   :  { %409 = vmatprep.subr.bf16.mxu1 %v2815_v37  ;;  %v2852_v19 = vld [vmem:[#allocation8 + $0x30] sm:$0xff]   ;;  %v2856_v23 = vld [vmem:[#allocation8 + $0x38] sm:$0xff]  }
  0x64   :  { %223 = vmatpush1.bf16.msra.mxu0 %v2811_v34  ;;  %v2859_v24 = vld [vmem:[#allocation5 + $0x14] ss:$56 sps:$4 sm:$0xff]   ;;  %v120_v28 = vld [vmem:[#allocation7] sm:$0x3]  ;;  %v305_v29 = vld [vmem:[#allocation7 + $0x2] sm:$0x3] }
  0x65   :  { %224 = vmatprep.subr.bf16.mxu0 %v2813_v36  ;;  %v125_v30 = vrot.slane %v120_v28, %v3273_v26  ;;  %v310_v31 = vrot.slane %v305_v29, %v3273_v26  ;;  %v129_v32 = vrot.slane %v120_v28, %v3275_v27  ;;  %v314_v33 = vrot.slane %v305_v29, %v3275_v27  ;;  %v2910_v25 = vld [vmem:[#allocation5 + $0x94] ss:$56 sps:$4 sm:$0xff]   ;;  %v2908_v28 = vld [vmem:[#allocation5 + $0x90] ss:$56 sps:$4 sm:$0xff]   ;;  %v2913_v29 = vld [vmem:[#allocation5 + $0x104] ss:$56 sps:$4 sm:$0xff]  }
  0x66   :  { %410 = vmatpush1.bf16.msra.mxu1 %v2818_v40 }
  0x67   :  { %411 = vmatprep.subr.bf16.mxu1 %v2821_v42 }
  0x68   :  { %225 = vmatpush1.bf16.msra.mxu0 %v2817_v39 }
  0x69   :  { %226 = vmatprep.subr.bf16.mxu0 %v2819_v41 }
  0x6a   :  { %412 = vmatpush1.bf16.msra.mxu1 %v2824_v44 }
  0x6b   :  { %2635 = vmatprep.subr.bf16.mxu1 %v2827_v46 }
  0x6c   :  { %227 = vmatpush1.bf16.msra.mxu0 %v2823_v43 }
  0x6d   :  { %2613 = vmatprep.subr.bf16.mxu0 %v2825_v45 }
  0xda   :  { %v79_v49 = vpop.xlane.xlu0 %78 }
  0xdb   :  { %v93_v50 = vpop.xlane.xlu1 %92  ;;  %v81_v51 = vsel %vm80_vm0, %v79_v49, 0.0 }
  0xde   :  { %v86_v52 = vpop.xlane.xlu0 %85 }
  0xdf   :  { %v88_v53 = vsel %vm87_vm1, %v86_v52, %v81_v51  ;;  %v100_v54 = vpop.xlane.xlu1 %99 }
  0xe0   :  { %v95_v55 = vsel %vm94_vm2, %v93_v50, %v88_v53  ;;  %v2857_v53 = vld [vmem:[#allocation5 + $0x10] ss:$56 sps:$4 sm:$0xff]  }
  0xe1   :  { %v102_v56 = vsel %vm101_vm3, %v100_v54, %v95_v55 }
  0xe2   :  { %v3268_v59 = vpack.c.bf16 %v102_v56, %v102_v56  ;;  %v2862_v56 = vld [vmem:[#allocation5 + $0x84] ss:$56 sps:$4 sm:$0xff]  }
  0xe4   :  { %245 = vmatmul.mubr.bf16.vlgmr.msra.gmra.mrb[0].mxu0 %v3268_v59  ;;  %430 = vmatmul.mubr.bf16.vlgmr.msra.gmra.mrb[0].mxu1 %v3268_v59 }
  0xe5   :  { %2614 = vmatpush3.bf16.msra.mxu0 %v2826_v57  ;;  %2636 = vmatpush3.bf16.msra.mxu1 %v2828_v58  ;;  %v2860_v57 = vld [vmem:[#allocation5 + $0x80] ss:$56 sps:$4 sm:$0xff]   ;;  %v2865_v58 = vld [vmem:[#allocation5 + $0xf4] ss:$56 sps:$4 sm:$0xff]  }
  0xe6   :  { %2615 = vmatprep.subr.bf16.mxu0 %v2829_v60  ;;  %2637 = vmatprep.subr.bf16.mxu1 %v2831_v61  ;;  %v2863_v60 = vld [vmem:[#allocation5 + $0xf0] ss:$56 sps:$4 sm:$0xff]   ;;  %v2868_v61 = vld [vmem:[#allocation5 + $0x164] ss:$56 sps:$4 sm:$0xff]  }
  0xe9   :  { %2616 = vmatpush3.bf16.msra.mxu0 %v2830_v62  ;;  %2638 = vmatpush3.bf16.msra.mxu1 %v2832_v63  ;;  %v2866_v62 = vld [vmem:[#allocation5 + $0x160] ss:$56 sps:$4 sm:$0xff]   ;;  %v2871_v63 = vld [vmem:[#allocation5 + $0x1d4] ss:$56 sps:$4 sm:$0xff]  }
  0xea   :  { %2617 = vmatprep.subr.bf16.mxu0 %v2833_v0  ;;  %2639 = vmatprep.subr.bf16.mxu1 %v2835_v1  ;;  %v2869_v0 = vld [vmem:[#allocation5 + $0x1d0] ss:$56 sps:$4 sm:$0xff]   ;;  %v2874_v1 = vld [vmem:[#allocation5 + $0x244] ss:$56 sps:$4 sm:$0xff]  }
  0xed   :  { %2618 = vmatpush3.bf16.msra.mxu0 %v2834_v2  ;;  %2640 = vmatpush3.bf16.msra.mxu1 %v2836_v3  ;;  %v2872_v2 = vld [vmem:[#allocation5 + $0x240] ss:$56 sps:$4 sm:$0xff]   ;;  %v2877_v3 = vld [vmem:[#allocation5 + $0x2b4] ss:$56 sps:$4 sm:$0xff]  }
  0xee   :  { %2619 = vmatprep.subr.bf16.mxu0 %v2837_v4  ;;  %2641 = vmatprep.subr.bf16.mxu1 %v2839_v5  ;;  %v2875_v4 = vld [vmem:[#allocation5 + $0x2b0] ss:$56 sps:$4 sm:$0xff]   ;;  %v2880_v5 = vld [vmem:[#allocation5 + $0x324] ss:$56 sps:$4 sm:$0xff]  }
  0xf1   :  { %2620 = vmatpush3.bf16.msra.mxu0 %v2838_v6  ;;  %2642 = vmatpush3.bf16.msra.mxu1 %v2840_v7  ;;  %v2878_v6 = vld [vmem:[#allocation5 + $0x320] ss:$56 sps:$4 sm:$0xff]   ;;  %v2883_v7 = vld [vmem:[#allocation5 + $0x1c] ss:$56 sps:$4 sm:$0xff]  }
  0xf2   :  { %2621 = vmatprep.subr.bf16.mxu0 %v2841_v8  ;;  %2643 = vmatprep.subr.bf16.mxu1 %v2843_v9  ;;  %v2881_v8 = vld [vmem:[#allocation5 + $0x18] ss:$56 sps:$4 sm:$0xff]   ;;  %v2886_v9 = vld [vmem:[#allocation5 + $0x8c] ss:$56 sps:$4 sm:$0xff]  }
  0xf5   :  { %2622 = vmatpush3.bf16.msra.mxu0 %v2842_v10  ;;  %2644 = vmatpush3.bf16.msra.mxu1 %v2844_v11  ;;  %v2884_v10 = vld [vmem:[#allocation5 + $0x88] ss:$56 sps:$4 sm:$0xff]   ;;  %v2889_v11 = vld [vmem:[#allocation5 + $0xfc] ss:$56 sps:$4 sm:$0xff]  }
  0xf6   :  { %2623 = vmatprep.subr.bf16.mxu0 %v2845_v12  ;;  %2645 = vmatprep.subr.bf16.mxu1 %v2847_v13  ;;  %v2887_v12 = vld [vmem:[#allocation5 + $0xf8] ss:$56 sps:$4 sm:$0xff]   ;;  %v2892_v13 = vld [vmem:[#allocation5 + $0x16c] ss:$56 sps:$4 sm:$0xff]  }
  0xf9   :  { %2624 = vmatpush3.bf16.msra.mxu0 %v2846_v14  ;;  %2646 = vmatpush3.bf16.msra.mxu1 %v2848_v15  ;;  %v2890_v14 = vld [vmem:[#allocation5 + $0x168] ss:$56 sps:$4 sm:$0xff]   ;;  %v2895_v15 = vld [vmem:[#allocation5 + $0x1dc] ss:$56 sps:$4 sm:$0xff]  }
  0xfa   :  { %2625 = vmatprep.subr.bf16.mxu0 %v2849_v16  ;;  %2647 = vmatprep.subr.bf16.mxu1 %v2851_v18  ;;  %v2893_v16 = vld [vmem:[#allocation5 + $0x1d8] ss:$56 sps:$4 sm:$0xff]   ;;  %v2896_v18 = vld [vmem:[#allocation5 + $0x248] ss:$56 sps:$4 sm:$0xff]  }
  0xfd   :  { %2626 = vmatpush3.bf16.msra.mxu0 %v2850_v17  ;;  %2648 = vmatpush3.bf16.msra.mxu1 %v2852_v19  ;;  %v2898_v17 = vld [vmem:[#allocation5 + $0x24c] ss:$56 sps:$4 sm:$0xff]   ;;  %v2901_v19 = vld [vmem:[#allocation5 + $0x2bc] ss:$56 sps:$4 sm:$0xff]  }
  0xfe   :  { %2627 = vmatprep.subr.bf16.mxu0 %v2853_v20  ;;  %2649 = vmatprep.subr.bf16.mxu1 %v2855_v22  ;;  %v2899_v20 = vld [vmem:[#allocation5 + $0x2b8] ss:$56 sps:$4 sm:$0xff]   ;;  %v2902_v22 = vld [vmem:[#allocation5 + $0x328] ss:$56 sps:$4 sm:$0xff]  }
 0x101   :  { %2628 = vmatpush3.bf16.msra.mxu0 %v2854_v21  ;;  %2650 = vmatpush3.bf16.msra.mxu1 %v2856_v23  ;;  %v2904_v21 = vld [vmem:[#allocation5 + $0x32c] ss:$56 sps:$4 sm:$0xff]  }
 0x102   :  { %854 = vmatprep.subr.bf16.mxu0 %v2859_v24  ;;  %v2907_v23 = vld [vmem:[#allocation5 + $0x24] ss:$56 sps:$4 sm:$0xff]   ;;  %v2905_v24 = vld [vmem:[#allocation5 + $0x20] ss:$56 sps:$4 sm:$0xff]  }
 0x1b7   :  { %v246_v34 = vpop.f32.mrb[0].mxu0  ;;  %v431_v35 = vpop.f32.mrb[0].mxu1 }
 0x1b8   :  { %v247_v36 = vadd.f32 %v246_v34, %v125_v30  ;;  %v432_v37 = vadd.f32 %v431_v35, %v310_v31  ;;  %v248_v39 = vpop.f32.mrb[1].mxu0  ;;  %v433_v40 = vpop.f32.mrb[1].mxu1  ;;  %v2911_v30 = vld [vmem:[#allocation5 + $0x100] ss:$56 sps:$4 sm:$0xff]   ;;  %v2916_v31 = vld [vmem:[#allocation5 + $0x174] ss:$56 sps:$4 sm:$0xff]  }
 0x1b9   :  { %v249_v41 = vadd.f32 %v248_v39, %v129_v32  ;;  %v434_v42 = vadd.f32 %v433_v40, %v314_v33  ;;  %v250_v43 = vpop.f32.mrb[2].mxu0  ;;  %v435_v44 = vpop.f32.mrb[2].mxu1  ;;  %v2914_v32 = vld [vmem:[#allocation5 + $0x170] ss:$56 sps:$4 sm:$0xff]   ;;  %v2919_v33 = vld [vmem:[#allocation5 + $0x1e4] ss:$56 sps:$4 sm:$0xff]  }
 0x1ba   :  { %v253_v45 = vmax.f32 %v247_v36, 0.0  ;;  %v438_v46 = vmax.f32 %v432_v37, 0.0  ;;  %v251_v47 = vpop.f32.mrb[3].mxu0  ;;  %v436_v48 = vpop.f32.mrb[3].mxu1  ;;  %v2917_v34 = vld [vmem:[#allocation5 + $0x1e0] ss:$56 sps:$4 sm:$0xff]  }
 0x1bb   :  { %v254_v49 = vmax.f32 %v249_v41, 0.0  ;;  %v439_v50 = vmax.f32 %v434_v42, 0.0  ;;  %v2922_v35 = vld [vmem:[#allocation5 + $0x254] ss:$56 sps:$4 sm:$0xff]   ;;  %v2920_v36 = vld [vmem:[#allocation5 + $0x250] ss:$56 sps:$4 sm:$0xff]  }
 0x1bc   :  { %v255_v54 = vpack.c.bf16 %v253_v45, %v253_v45  ;;  %v440_v55 = vpack.c.bf16 %v438_v46, %v438_v46  ;;  %v2925_v37 = vld [vmem:[#allocation5 + $0x2c4] ss:$56 sps:$4 sm:$0xff]   ;;  %v2923_v39 = vld [vmem:[#allocation5 + $0x2c0] ss:$56 sps:$4 sm:$0xff]   ;;  %v2928_v40 = vld [vmem:[#allocation5 + $0x334] ss:$56 sps:$4 sm:$0xff]  }
 0x1bd   :  { %v256_v51 = vpack.c.bf16 %v254_v49, %v254_v49  ;;  %v441_v52 = vpack.c.bf16 %v439_v50, %v439_v50  ;;  %v2977_v41 = vld [vmem:[#allocation8 + $0x140] sm:$0xff]   ;;  %v2979_v43 = vld [vmem:[#allocation8 + $0x148] sm:$0xff]   ;;  %v2981_v47 = vld [vmem:[#allocation8 + $0x150] sm:$0xff]  }
 0x1be   :  { %v2978_v42 = vld [vmem:[#allocation8 + $0x100] sm:$0xff]   ;;  %2657 = vmatprep.subr.bf16.mxu1 %v2977_v41  ;;  %v2980_v46 = vld [vmem:[#allocation8 + $0x108] sm:$0xff]   ;;  %v2929_v48 = vld [vmem:[#allocation5 + $0x28] ss:$56 sps:$4 sm:$0xff]  }
 0x1bf   :  { %602 = vmatprep.mubr.bf16.mxu0 %v441_v52  ;;  %738 = vmatprep.mubr.bf16.mxu1 %v256_v51  ;;  %v2926_v44 = vld [vmem:[#allocation5 + $0x330] ss:$56 sps:$4 sm:$0xff]   ;;  %v2931_v45 = vld [vmem:[#allocation5 + $0x2c] ss:$56 sps:$4 sm:$0xff]   ;;  %v2934_v49 = vld [vmem:[#allocation5 + $0x9c] ss:$56 sps:$4 sm:$0xff]  }
 0x1c0   :  { %603 = vmatmul.mubr.bf16.vlgmr.msra.gmra.mrb[4].mxu0 %v440_v55  ;;  %739 = vmatmul.mubr.bf16.vlgmr.msra.gmra.mrb[4].mxu1 %v255_v54  ;;  %v2982_v50 = vld [vmem:[#allocation8 + $0x110] sm:$0xff]   ;;  %v2983_v51 = vld [vmem:[#allocation8 + $0x158] sm:$0xff]   ;;  %v2932_v52 = vld [vmem:[#allocation5 + $0x98] ss:$56 sps:$4 sm:$0xff]  }
 0x1c1   :  { %855 = vmatpush1.bf16.msra.mxu0 %v2857_v53  ;;  %886 = vmatprep.mubr.bf16.mxu0 %v3185_v38  ;;  %v2937_v53 = vld [vmem:[#allocation5 + $0x10c] ss:$56 sps:$4 sm:$0xff]  }
 0x1c2   :  { %856 = vmatprep.subr.bf16.mxu0 %v2862_v56  ;;  %2658 = vmatpush3.bf16.msra.mxu1 %v2978_v42  ;;  %v2984_v54 = vld [vmem:[#allocation8 + $0x118] sm:$0xff]   ;;  %v2985_v55 = vld [vmem:[#allocation8 + $0x160] sm:$0xff]   ;;  %v762_v41 = vld [vmem:[#allocation7 + $0x4] sm:$0x3] }
 0x1c3   :  { %2659 = vmatprep.subr.bf16.mxu1 %v2979_v43  ;;  %v2935_v56 = vld [vmem:[#allocation5 + $0x108] ss:$56 sps:$4 sm:$0xff]   ;;  %v767_v42 = vrot.slane %v762_v41, %v3273_v26  ;;  %v771_v43 = vrot.slane %v762_v41, %v3275_v27 }
 0x1c5   :  { %857 = vmatpush1.bf16.msra.mxu0 %v2860_v57  ;;  %v2940_v57 = vld [vmem:[#allocation5 + $0x17c] ss:$56 sps:$4 sm:$0xff]  }
 0x1c6   :  { %858 = vmatprep.subr.bf16.mxu0 %v2865_v58  ;;  %2660 = vmatpush3.bf16.msra.mxu1 %v2980_v46  ;;  %v2986_v58 = vld [vmem:[#allocation8 + $0x120] sm:$0xff]  }
 0x1c7   :  { %2661 = vmatprep.subr.bf16.mxu1 %v2981_v47 }
 0x1c9   :  { %859 = vmatpush1.bf16.msra.mxu0 %v2863_v60  ;;  %v2987_v60 = vld [vmem:[#allocation8 + $0x168] sm:$0xff]  }
 0x1ca   :  { %860 = vmatprep.subr.bf16.mxu0 %v2868_v61  ;;  %2662 = vmatpush3.bf16.msra.mxu1 %v2982_v50  ;;  %v2938_v61 = vld [vmem:[#allocation5 + $0x178] ss:$56 sps:$4 sm:$0xff]  }
 0x1cb   :  { %2663 = vmatprep.subr.bf16.mxu1 %v2983_v51 }
 0x1cd   :  { %861 = vmatpush1.bf16.msra.mxu0 %v2866_v62  ;;  %v2943_v62 = vld [vmem:[#allocation5 + $0x1ec] ss:$56 sps:$4 sm:$0xff]  }
 0x1ce   :  { %862 = vmatprep.subr.bf16.mxu0 %v2871_v63  ;;  %2664 = vmatpush3.bf16.msra.mxu1 %v2984_v54  ;;  %v2988_v63 = vld [vmem:[#allocation8 + $0x128] sm:$0xff]  }
 0x1cf   :  { %2665 = vmatprep.subr.bf16.mxu1 %v2985_v55  ;;  %v2995_v54 = vld [vmem:[#allocation8 + $0x1c8] sm:$0xff]  }
 0x1d0   :  { %v2996_v55 = vld [vmem:[#allocation8 + $0x188] sm:$0xff]  }
 0x1d1   :  { %863 = vmatpush1.bf16.msra.mxu0 %v2869_v0  ;;  %v2941_v0 = vld [vmem:[#allocation5 + $0x1e8] ss:$56 sps:$4 sm:$0xff]  }
 0x1d2   :  { %864 = vmatprep.subr.bf16.mxu0 %v2874_v1  ;;  %2666 = vmatpush3.bf16.msra.mxu1 %v2986_v58  ;;  %v2946_v1 = vld [vmem:[#allocation5 + $0x25c] ss:$56 sps:$4 sm:$0xff]   ;;  %v2999_v58 = vld [vmem:[#allocation8 + $0x1d8] sm:$0xff]  }
 0x1d3   :  { %2667 = vmatprep.subr.bf16.mxu1 %v2987_v60  ;;  %v3000_v60 = vld [vmem:[#allocation8 + $0x198] sm:$0xff]  }
 0x1d5   :  { %865 = vmatpush1.bf16.msra.mxu0 %v2872_v2  ;;  %v2944_v2 = vld [vmem:[#allocation5 + $0x258] ss:$56 sps:$4 sm:$0xff]  }
 0x1d6   :  { %866 = vmatprep.subr.bf16.mxu0 %v2877_v3  ;;  %2668 = vmatpush3.bf16.msra.mxu1 %v2988_v63  ;;  %v2949_v3 = vld [vmem:[#allocation5 + $0x2cc] ss:$56 sps:$4 sm:$0xff]   ;;  %v3003_v63 = vld [vmem:[#allocation8 + $0x1e8] sm:$0xff]  }
 0x1d9   :  { %867 = vmatpush1.bf16.msra.mxu0 %v2875_v4  ;;  %v2989_v4 = vld [vmem:[#allocation8 + $0x170] sm:$0xff]  }
 0x1da   :  { %868 = vmatprep.subr.bf16.mxu0 %v2880_v5  ;;  %v2990_v5 = vld [vmem:[#allocation8 + $0x130] sm:$0xff]   ;;  %2669 = vmatprep.subr.bf16.mxu1 %v2989_v4 }
 0x1db   :  { %2670 = vmatpush3.bf16.msra.mxu1 %v2990_v5  ;;  %v3006_v5 = vld [vmem:[#allocation8 + $0x1b0] sm:$0xff]  }
 0x1dd   :  { %869 = vmatpush1.bf16.msra.mxu0 %v2878_v6  ;;  %v2947_v6 = vld [vmem:[#allocation5 + $0x2c8] ss:$56 sps:$4 sm:$0xff]  }
 0x1de   :  { %1176 = vmatprep.subr.bf16.mxu0 %v2883_v7  ;;  %v2952_v7 = vld [vmem:[#allocation5 + $0x33c] ss:$56 sps:$4 sm:$0xff]  }
 0x1e0   :  { %887 = vmatmul.mubr.bf16.vlgmr.msra.gmra.mrb[8].mxu0 %v3268_v59 }
 0x1e1   :  { %1177 = vmatpush1.bf16.msra.mxu0 %v2881_v8  ;;  %1208 = vmatprep.mubr.bf16.mxu0 %v3185_v38  ;;  %v2991_v8 = vld [vmem:[#allocation8 + $0x178] sm:$0xff]  }
 0x1e2   :  { %1178 = vmatprep.subr.bf16.mxu0 %v2886_v9  ;;  %v2992_v9 = vld [vmem:[#allocation8 + $0x138] sm:$0xff]   ;;  %2671 = vmatprep.subr.bf16.mxu1 %v2991_v8 }
 0x1e3   :  { %2672 = vmatpush3.bf16.msra.mxu1 %v2992_v9 }
 0x1e5   :  { %1179 = vmatpush1.bf16.msra.mxu0 %v2884_v10  ;;  %v2950_v10 = vld [vmem:[#allocation5 + $0x338] ss:$56 sps:$4 sm:$0xff]  }
 0x1e6   :  { %1180 = vmatprep.subr.bf16.mxu0 %v2889_v11  ;;  %v2955_v11 = vld [vmem:[#allocation5 + $0x34] ss:$56 sps:$4 sm:$0xff]  }
 0x1e9   :  { %1181 = vmatpush1.bf16.msra.mxu0 %v2887_v12  ;;  %v2993_v12 = vld [vmem:[#allocation8 + $0x1c0] sm:$0xff]  }
 0x1ea   :  { %1182 = vmatprep.subr.bf16.mxu0 %v2892_v13  ;;  %2679 = vmatprep.subr.bf16.mxu1 %v2993_v12  ;;  %v2953_v13 = vld [vmem:[#allocation5 + $0x30] ss:$56 sps:$4 sm:$0xff]  }
 0x1eb   :  { %v3008_v12 = vld [vmem:[#allocation8 + $0x1b8] sm:$0xff]  }
 0x1ed   :  { %1183 = vmatpush1.bf16.msra.mxu0 %v2890_v14  ;;  %v2958_v14 = vld [vmem:[#allocation5 + $0xa4] ss:$56 sps:$4 sm:$0xff]  }
 0x1ee   :  { %1184 = vmatprep.subr.bf16.mxu0 %v2895_v15  ;;  %v2956_v15 = vld [vmem:[#allocation5 + $0xa0] ss:$56 sps:$4 sm:$0xff]  }
 0x1f1   :  { %1185 = vmatpush1.bf16.msra.mxu0 %v2893_v16  ;;  %v2961_v16 = vld [vmem:[#allocation5 + $0x114] ss:$56 sps:$4 sm:$0xff]  }
 0x1f2   :  { %1186 = vmatprep.subr.bf16.mxu0 %v2898_v17  ;;  %v2959_v17 = vld [vmem:[#allocation5 + $0x110] ss:$56 sps:$4 sm:$0xff]  }
 0x1f5   :  { %1187 = vmatpush1.bf16.msra.mxu0 %v2896_v18  ;;  %v2964_v18 = vld [vmem:[#allocation5 + $0x184] ss:$56 sps:$4 sm:$0xff]  }
 0x1f6   :  { %1188 = vmatprep.subr.bf16.mxu0 %v2901_v19  ;;  %v2962_v19 = vld [vmem:[#allocation5 + $0x180] ss:$56 sps:$4 sm:$0xff]  }
 0x1f9   :  { %1189 = vmatpush1.bf16.msra.mxu0 %v2899_v20  ;;  %v2967_v20 = vld [vmem:[#allocation5 + $0x1f4] ss:$56 sps:$4 sm:$0xff]  }
 0x1fa   :  { %1190 = vmatprep.subr.bf16.mxu0 %v2904_v21  ;;  %v2965_v21 = vld [vmem:[#allocation5 + $0x1f0] ss:$56 sps:$4 sm:$0xff]  }
 0x1fd   :  { %1191 = vmatpush1.bf16.msra.mxu0 %v2902_v22  ;;  %v2970_v22 = vld [vmem:[#allocation5 + $0x264] ss:$56 sps:$4 sm:$0xff]  }
 0x1fe   :  { %1498 = vmatprep.subr.bf16.mxu0 %v2907_v23  ;;  %v2968_v23 = vld [vmem:[#allocation5 + $0x260] ss:$56 sps:$4 sm:$0xff]  }
 0x200   :  { %1209 = vmatmul.mubr.bf16.vlgmr.msra.gmra.mrb[12].mxu0 %v3268_v59 }
 0x201   :  { %1499 = vmatpush1.bf16.msra.mxu0 %v2905_v24  ;;  %1530 = vmatprep.mubr.bf16.mxu0 %v3185_v38  ;;  %v2973_v24 = vld [vmem:[#allocation5 + $0x2d4] ss:$56 sps:$4 sm:$0xff]  }
 0x202   :  { %1500 = vmatprep.subr.bf16.mxu0 %v2910_v25  ;;  %v2976_v25 = vld [vmem:[#allocation5 + $0x344] ss:$56 sps:$4 sm:$0xff]  }
 0x205   :  { %1501 = vmatpush1.bf16.msra.mxu0 %v2908_v28  ;;  %v2974_v28 = vld [vmem:[#allocation5 + $0x340] ss:$56 sps:$4 sm:$0xff]  }
 0x206   :  { %1502 = vmatprep.subr.bf16.mxu0 %v2913_v29 }
 0x209   :  { %1503 = vmatpush1.bf16.msra.mxu0 %v2911_v30 }
 0x20a   :  { %1504 = vmatprep.subr.bf16.mxu0 %v2916_v31 }
 0x20d   :  { %1505 = vmatpush1.bf16.msra.mxu0 %v2914_v32 }
 0x20e   :  { %1506 = vmatprep.subr.bf16.mxu0 %v2919_v33 }
 0x211   :  { %1507 = vmatpush1.bf16.msra.mxu0 %v2917_v34 }
 0x212   :  { %1508 = vmatprep.subr.bf16.mxu0 %v2922_v35 }
 0x215   :  { %1509 = vmatpush1.bf16.msra.mxu0 %v2920_v36 }
 0x216   :  { %1510 = vmatprep.subr.bf16.mxu0 %v2925_v37 }
 0x219   :  { %1511 = vmatpush1.bf16.msra.mxu0 %v2923_v39 }
 0x21a   :  { %1512 = vmatprep.subr.bf16.mxu0 %v2928_v40 }
 0x21d   :  { %1513 = vmatpush1.bf16.msra.mxu0 %v2926_v44 }
 0x21e   :  { %1820 = vmatprep.subr.bf16.mxu0 %v2931_v45 }
 0x220   :  { %1531 = vmatmul.mubr.bf16.vlgmr.msra.gmra.mrb[16].mxu0 %v3268_v59 }
 0x221   :  { %1821 = vmatpush1.bf16.msra.mxu0 %v2929_v48  ;;  %1852 = vmatprep.mubr.bf16.mxu0 %v3185_v38 }
 0x222   :  { %1822 = vmatprep.subr.bf16.mxu0 %v2934_v49 }
 0x225   :  { %1823 = vmatpush1.bf16.msra.mxu0 %v2932_v52  ;;  %v2994_v52 = vld [vmem:[#allocation8 + $0x180] sm:$0xff]  }
 0x226   :  { %1824 = vmatprep.subr.bf16.mxu0 %v2937_v53 }
 0x229   :  { %1825 = vmatpush1.bf16.msra.mxu0 %v2935_v56  ;;  %v2997_v56 = vld [vmem:[#allocation8 + $0x1d0] sm:$0xff]  }
 0x22a   :  { %1826 = vmatprep.subr.bf16.mxu0 %v2940_v57  ;;  %v2998_v57 = vld [vmem:[#allocation8 + $0x190] sm:$0xff]  }
 0x22d   :  { %1827 = vmatpush1.bf16.msra.mxu0 %v2938_v61  ;;  %v3001_v61 = vld [vmem:[#allocation8 + $0x1e0] sm:$0xff]  }
 0x22e   :  { %1828 = vmatprep.subr.bf16.mxu0 %v2943_v62  ;;  %v3002_v62 = vld [vmem:[#allocation8 + $0x1a0] sm:$0xff]  }
 0x231   :  { %1829 = vmatpush1.bf16.msra.mxu0 %v2941_v0  ;;  %v3004_v0 = vld [vmem:[#allocation8 + $0x1a8] sm:$0xff]  }
 0x232   :  { %1830 = vmatprep.subr.bf16.mxu0 %v2946_v1  ;;  %v1084_v1 = vld [vmem:[#allocation7 + $0x6] sm:$0x3] }
 0x233   :  { %v1093_v4 = vrot.slane %v1084_v1, %v3275_v27 }
 0x235   :  { %1831 = vmatpush1.bf16.msra.mxu0 %v2944_v2  ;;  %v3005_v2 = vld [vmem:[#allocation8 + $0x1f0] sm:$0xff]  }
 0x236   :  { %1832 = vmatprep.subr.bf16.mxu0 %v2949_v3  ;;  %v1089_v3 = vrot.slane %v1084_v1, %v3273_v26 }
 0x239   :  { %1833 = vmatpush1.bf16.msra.mxu0 %v2947_v6  ;;  %v3007_v6 = vld [vmem:[#allocation8 + $0x1f8] sm:$0xff]  }
 0x23a   :  { %1834 = vmatprep.subr.bf16.mxu0 %v2952_v7 }
 0x23d   :  { %1835 = vmatpush1.bf16.msra.mxu0 %v2950_v10 }
 0x23e   :  { %2142 = vmatprep.subr.bf16.mxu0 %v2955_v11 }
 0x240   :  { %1853 = vmatmul.mubr.bf16.vlgmr.msra.gmra.mrb[20].mxu0 %v3268_v59 }
 0x241   :  { %2143 = vmatpush1.bf16.msra.mxu0 %v2953_v13  ;;  %2174 = vmatprep.mubr.bf16.mxu0 %v3185_v38  ;;  %v2971_v38 = vld [vmem:[#allocation5 + $0x2d0] ss:$56 sps:$4 sm:$0xff]  }
 0x242   :  { %2144 = vmatprep.subr.bf16.mxu0 %v2958_v14 }
 0x245   :  { %2145 = vmatpush1.bf16.msra.mxu0 %v2956_v15  ;;  %v3009_v15 = vld [vmem:[#allocation8 + $0x240] sm:$0xff]  }
 0x246   :  { %2146 = vmatprep.subr.bf16.mxu0 %v2961_v16 }
 0x249   :  { %2147 = vmatpush1.bf16.msra.mxu0 %v2959_v17 }
 0x24a   :  { %2148 = vmatprep.subr.bf16.mxu0 %v2964_v18  ;;  %v3010_v18 = vld [vmem:[#allocation8 + $0x200] sm:$0xff]  }
 0x24d   :  { %2149 = vmatpush1.bf16.msra.mxu0 %v2962_v19 }
 0x24e   :  { %2150 = vmatprep.subr.bf16.mxu0 %v2967_v20  ;;  %v3011_v20 = vld [vmem:[#allocation8 + $0x248] sm:$0xff]  }
 0x251   :  { %2151 = vmatpush1.bf16.msra.mxu0 %v2965_v21  ;;  %v3012_v21 = vld [vmem:[#allocation8 + $0x208] sm:$0xff]  }
 0x252   :  { %2152 = vmatprep.subr.bf16.mxu0 %v2970_v22  ;;  %v3013_v22 = vld [vmem:[#allocation8 + $0x250] sm:$0xff]  }
 0x255   :  { %2153 = vmatpush1.bf16.msra.mxu0 %v2968_v23  ;;  %v3014_v23 = vld [vmem:[#allocation8 + $0x210] sm:$0xff]  }
 0x256   :  { %2154 = vmatprep.subr.bf16.mxu0 %v2973_v24  ;;  %v3015_v24 = vld [vmem:[#allocation8 + $0x258] sm:$0xff]  }
 0x259   :  { %2155 = vmatpush1.bf16.msra.mxu0 %v2971_v38  ;;  %v3016_v38 = vld [vmem:[#allocation8 + $0x218] sm:$0xff]  }
 0x25a   :  { %2156 = vmatprep.subr.bf16.mxu0 %v2976_v25  ;;  %v3017_v25 = vld [vmem:[#allocation8 + $0x260] sm:$0xff]  }
 0x25d   :  { %2157 = vmatpush1.bf16.msra.mxu0 %v2974_v28  ;;  %v3018_v28 = vld [vmem:[#allocation8 + $0x220] sm:$0xff]  }
 0x260   :  { %2175 = vmatmul.mubr.bf16.vlgmr.msra.gmra.mrb[24].mxu0 %v3268_v59 }
 0x293   :  { %v2629_v29 = vpop.f32.mrb[4].mxu0  ;;  %v2651_v30 = vpop.f32.mrb[4].mxu1 }
 0x294   :  { %v2630_v31 = vpop.f32.mrb[5].mxu0  ;;  %v2652_v32 = vpop.f32.mrb[5].mxu1 }
 0x295   :  { %v2631_v33 = vadd.f32 %v2630_v31, %v2629_v29  ;;  %v2653_v34 = vadd.f32 %v2652_v32, %v2651_v30  ;;  %v2632_v35 = vpop.f32.mrb[6].mxu0  ;;  %v2654_v36 = vpop.f32.mrb[6].mxu1  ;;  %v3019_v29 = vld [vmem:[#allocation8 + $0x268] sm:$0xff]   ;;  %v1406_v31 = vld [vmem:[#allocation7 + $0x8] sm:$0x3]  ;;  %v3021_v32 = vld [vmem:[#allocation8 + $0x270] sm:$0xff]  }
 0x296   :  { %v2633_v37 = vpop.f32.mrb[7].mxu0  ;;  %v2655_v39 = vpop.f32.mrb[7].mxu1  ;;  %v3020_v30 = vld [vmem:[#allocation8 + $0x228] sm:$0xff]   ;;  %v3022_v35 = vld [vmem:[#allocation8 + $0x230] sm:$0xff]   ;;  %v3023_v36 = vld [vmem:[#allocation8 + $0x278] sm:$0xff]  }
 0x297   :  { %v3291_v40 = vadd.f32 %v2653_v34, %v2631_v33  ;;  %v1411_v33 = vrot.slane %v1406_v31, %v3273_v26  ;;  %v1415_v34 = vrot.slane %v1406_v31, %v3275_v27 }
 0x2b3   :  { %v888_v44 = vpop.f32.mrb[8].mxu0 }
 0x2b4   :  { %v889_v45 = vadd.f32 %v888_v44, %v767_v42  ;;  %v890_v59 = vpop.f32.mrb[9].mxu0  ;;  %v3024_v44 = vld [vmem:[#allocation8 + $0x238] sm:$0xff]  }
 0x2b5   :  { %v891_v46 = vadd.f32 %v890_v59, %v771_v43  ;;  %v892_v47 = vpop.f32.mrb[10].mxu0 }
 0x2b6   :  { %v895_v48 = vmax.f32 %v889_v45, 0.0  ;;  %v893_v49 = vpop.f32.mrb[11].mxu0 }
 0x2b7   :  { %v896_v50 = vmax.f32 %v891_v46, 0.0  ;;  %v3025_v46 = vld [vmem:[#allocation8 + $0x2c0] sm:$0xff]  }
 0x2b8   :  { %v897_v53 = vpack.c.bf16 %v895_v48, %v895_v48  ;;  %v3026_v49 = vld [vmem:[#allocation8 + $0x280] sm:$0xff]  }
 0x2b9   :  { %v898_v51 = vpack.c.bf16 %v896_v50, %v896_v50 }
 0x2bb   :  { %1059 = vmatprep.mubr.bf16.mxu1 %v898_v51  ;;  %v3027_v51 = vld [vmem:[#allocation8 + $0x2c8] sm:$0xff]  }
 0x2bc   :  { %1060 = vmatmul.mubr.bf16.vlgmr.msra.gmra.mrb[8].mxu1 %v897_v53  ;;  %v3029_v53 = vld [vmem:[#allocation8 + $0x2d0] sm:$0xff]  }
 0x2bd   :  { %2680 = vmatpush3.bf16.msra.mxu1 %v2994_v52  ;;  %v3028_v52 = vld [vmem:[#allocation8 + $0x288] sm:$0xff]  }
 0x2be   :  { %2681 = vmatprep.subr.bf16.mxu1 %v2995_v54  ;;  %v3030_v54 = vld [vmem:[#allocation8 + $0x290] sm:$0xff]  }
 0x2c1   :  { %2682 = vmatpush3.bf16.msra.mxu1 %v2996_v55  ;;  %v3031_v55 = vld [vmem:[#allocation8 + $0x2d8] sm:$0xff]  }
 0x2c2   :  { %2683 = vmatprep.subr.bf16.mxu1 %v2997_v56  ;;  %v3032_v56 = vld [vmem:[#allocation8 + $0x298] sm:$0xff]  }
 0x2c5   :  { %2684 = vmatpush3.bf16.msra.mxu1 %v2998_v57  ;;  %v3033_v57 = vld [vmem:[#allocation8 + $0x2e0] sm:$0xff]  }
 0x2c6   :  { %2685 = vmatprep.subr.bf16.mxu1 %v2999_v58  ;;  %v3034_v58 = vld [vmem:[#allocation8 + $0x2a0] sm:$0xff]  }
 0x2c9   :  { %2686 = vmatpush3.bf16.msra.mxu1 %v3000_v60  ;;  %v3035_v60 = vld [vmem:[#allocation8 + $0x2e8] sm:$0xff]  }
 0x2ca   :  { %2687 = vmatprep.subr.bf16.mxu1 %v3001_v61  ;;  %v3036_v61 = vld [vmem:[#allocation8 + $0x2a8] sm:$0xff]  }
 0x2cd   :  { %2688 = vmatpush3.bf16.msra.mxu1 %v3002_v62  ;;  %v1728_v62 = vld [vmem:[#allocation7 + $0xa] sm:$0x3] }
 0x2ce   :  { %2689 = vmatprep.subr.bf16.mxu1 %v3003_v63  ;;  %v3037_v63 = vld [vmem:[#allocation8 + $0x2f0] sm:$0xff]   ;;  %v1737_v1 = vrot.slane %v1728_v62, %v3275_v27 }
 0x2d1   :  { %2690 = vmatpush3.bf16.msra.mxu1 %v3004_v0  ;;  %v1733_v0 = vrot.slane %v1728_v62, %v3273_v26 }
 0x2d2   :  { %2691 = vmatprep.subr.bf16.mxu1 %v3005_v2  ;;  %v3038_v2 = vld [vmem:[#allocation8 + $0x2b0] sm:$0xff]  }
 0x2d3   :  { %v1210_v7 = vpop.f32.mrb[12].mxu0 }
 0x2d4   :  { %v1211_v8 = vadd.f32 %v1210_v7, %v1089_v3  ;;  %v1212_v9 = vpop.f32.mrb[13].mxu0  ;;  %v3039_v3 = vld [vmem:[#allocation8 + $0x2f8] sm:$0xff]  }
 0x2d5   :  { %v1213_v10 = vadd.f32 %v1212_v9, %v1093_v4  ;;  %v1214_v11 = vpop.f32.mrb[14].mxu0  ;;  %2692 = vmatpush3.bf16.msra.mxu1 %v3006_v5  ;;  %v3040_v9 = vld [vmem:[#allocation8 + $0x2b8] sm:$0xff]  }
 0x2d6   :  { %v1217_v13 = vmax.f32 %v1211_v8, 0.0  ;;  %v1215_v14 = vpop.f32.mrb[15].mxu0  ;;  %2693 = vmatprep.subr.bf16.mxu1 %v3007_v6 }
 0x2d7   :  { %v1218_v16 = vmax.f32 %v1213_v10, 0.0 }
 0x2d8   :  { %v1219_v19 = vpack.c.bf16 %v1217_v13, %v1217_v13 }
 0x2d9   :  { %v1220_v17 = vpack.c.bf16 %v1218_v16, %v1218_v16  ;;  %2694 = vmatpush3.bf16.msra.mxu1 %v3008_v12  ;;  %v3041_v12 = vld [vmem:[#allocation8 + $0x340] sm:$0xff]  }
 0x2da   :  { %2701 = vmatprep.subr.bf16.mxu1 %v3009_v15  ;;  %v3042_v15 = vld [vmem:[#allocation8 + $0x300] sm:$0xff]  }
 0x2db   :  { %1381 = vmatprep.mubr.bf16.mxu1 %v1220_v17  ;;  %v3043_v17 = vld [vmem:[#allocation8 + $0x348] sm:$0xff]  }
 0x2dc   :  { %1382 = vmatmul.mubr.bf16.vlgmr.msra.gmra.mrb[12].mxu1 %v1219_v19  ;;  %v3045_v19 = vld [vmem:[#allocation8 + $0x350] sm:$0xff]  }
 0x2dd   :  { %2702 = vmatpush3.bf16.msra.mxu1 %v3010_v18  ;;  %v3044_v18 = vld [vmem:[#allocation8 + $0x308] sm:$0xff]  }
 0x2de   :  { %2703 = vmatprep.subr.bf16.mxu1 %v3011_v20  ;;  %v3046_v20 = vld [vmem:[#allocation8 + $0x310] sm:$0xff]  }
 0x2e1   :  { %2704 = vmatpush3.bf16.msra.mxu1 %v3012_v21  ;;  %v3047_v21 = vld [vmem:[#allocation8 + $0x358] sm:$0xff]  }
 0x2e2   :  { %2705 = vmatprep.subr.bf16.mxu1 %v3013_v22  ;;  %v3048_v22 = vld [vmem:[#allocation8 + $0x318] sm:$0xff]  }
 0x2e5   :  { %2706 = vmatpush3.bf16.msra.mxu1 %v3014_v23  ;;  %v3049_v23 = vld [vmem:[#allocation8 + $0x360] sm:$0xff]  }
 0x2e6   :  { %2707 = vmatprep.subr.bf16.mxu1 %v3015_v24  ;;  %v3050_v24 = vld [vmem:[#allocation8 + $0x320] sm:$0xff]  }
 0x2e9   :  { %2708 = vmatpush3.bf16.msra.mxu1 %v3016_v38  ;;  %v3051_v38 = vld [vmem:[#allocation8 + $0x368] sm:$0xff]  }
 0x2ea   :  { %2709 = vmatprep.subr.bf16.mxu1 %v3017_v25  ;;  %v3052_v25 = vld [vmem:[#allocation8 + $0x328] sm:$0xff]  }
 0x2ed   :  { %2710 = vmatpush3.bf16.msra.mxu1 %v3018_v28  ;;  %v2050_v28 = vld [vmem:[#allocation7 + $0xc] sm:$0x3] }
 0x2ee   :  { %2711 = vmatprep.subr.bf16.mxu1 %v3019_v29  ;;  %v3053_v29 = vld [vmem:[#allocation8 + $0x370] sm:$0xff]   ;;  %v2059_v31 = vrot.slane %v2050_v28, %v3275_v27 }
 0x2f1   :  { %2712 = vmatpush3.bf16.msra.mxu1 %v3020_v30  ;;  %v2055_v30 = vrot.slane %v2050_v28, %v3273_v26 }
 0x2f2   :  { %2713 = vmatprep.subr.bf16.mxu1 %v3021_v32  ;;  %v3054_v32 = vld [vmem:[#allocation8 + $0x330] sm:$0xff]  }
 0x2f3   :  { %v1532_v37 = vpop.f32.mrb[16].mxu0 }
 0x2f4   :  { %v1533_v39 = vadd.f32 %v1532_v37, %v1411_v33  ;;  %v1534_v41 = vpop.f32.mrb[17].mxu0  ;;  %v3055_v33 = vld [vmem:[#allocation8 + $0x378] sm:$0xff]  }
 0x2f5   :  { %v1535_v42 = vadd.f32 %v1534_v41, %v1415_v34  ;;  %v1536_v43 = vpop.f32.mrb[18].mxu0  ;;  %2714 = vmatpush3.bf16.msra.mxu1 %v3022_v35  ;;  %v3056_v41 = vld [vmem:[#allocation8 + $0x338] sm:$0xff]  }
 0x2f6   :  { %v1539_v45 = vmax.f32 %v1533_v39, 0.0  ;;  %v1537_v59 = vpop.f32.mrb[19].mxu0  ;;  %2715 = vmatprep.subr.bf16.mxu1 %v3023_v36 }
 0x2f7   :  { %v1540_v47 = vmax.f32 %v1535_v42, 0.0 }
 0x2f8   :  { %v1541_v50 = vpack.c.bf16 %v1539_v45, %v1539_v45 }
 0x2f9   :  { %v1542_v48 = vpack.c.bf16 %v1540_v47, %v1540_v47  ;;  %2716 = vmatpush3.bf16.msra.mxu1 %v3024_v44 }
 0x2fa   :  { %2723 = vmatprep.subr.bf16.mxu1 %v3025_v46 }
 0x2fb   :  { %1703 = vmatprep.mubr.bf16.mxu1 %v1542_v48 }
 0x2fc   :  { %1704 = vmatmul.mubr.bf16.vlgmr.msra.gmra.mrb[16].mxu1 %v1541_v50 }
 0x2fd   :  { %2724 = vmatpush3.bf16.msra.mxu1 %v3026_v49 }
 0x2fe   :  { %2725 = vmatprep.subr.bf16.mxu1 %v3027_v51 }
 0x301   :  { %2726 = vmatpush3.bf16.msra.mxu1 %v3028_v52 }
 0x302   :  { %2727 = vmatprep.subr.bf16.mxu1 %v3029_v53 }
 0x305   :  { %2728 = vmatpush3.bf16.msra.mxu1 %v3030_v54 }
 0x306   :  { %2729 = vmatprep.subr.bf16.mxu1 %v3031_v55 }
 0x309   :  { %2730 = vmatpush3.bf16.msra.mxu1 %v3032_v56 }
 0x30a   :  { %2731 = vmatprep.subr.bf16.mxu1 %v3033_v57 }
 0x30d   :  { %2732 = vmatpush3.bf16.msra.mxu1 %v3034_v58 }
 0x30e   :  { %2733 = vmatprep.subr.bf16.mxu1 %v3035_v60 }
 0x311   :  { %2734 = vmatpush3.bf16.msra.mxu1 %v3036_v61 }
 0x312   :  { %2735 = vmatprep.subr.bf16.mxu1 %v3037_v63 }
 0x313   :  { %v1854_v4 = vpop.f32.mrb[20].mxu0 }
 0x314   :  { %v1855_v5 = vadd.f32 %v1854_v4, %v1733_v0  ;;  %v1856_v6 = vpop.f32.mrb[21].mxu0 }
 0x315   :  { %v1857_v7 = vadd.f32 %v1856_v6, %v1737_v1  ;;  %v1858_v8 = vpop.f32.mrb[22].mxu0  ;;  %2736 = vmatpush3.bf16.msra.mxu1 %v3038_v2 }
 0x316   :  { %v1861_v10 = vmax.f32 %v1855_v5, 0.0  ;;  %v1859_v11 = vpop.f32.mrb[23].mxu0  ;;  %2737 = vmatprep.subr.bf16.mxu1 %v3039_v3 }
 0x317   :  { %v1862_v13 = vmax.f32 %v1857_v7, 0.0 }
 0x318   :  { %v1863_v16 = vpack.c.bf16 %v1861_v10, %v1861_v10 }
 0x319   :  { %v1864_v14 = vpack.c.bf16 %v1862_v13, %v1862_v13  ;;  %2738 = vmatpush3.bf16.msra.mxu1 %v3040_v9  ;;  %v2612_v9 = vld [vmem:[%s3323_s4] ss:$0 sm:$0xff] }
 0x31a   :  { %2745 = vmatprep.subr.bf16.mxu1 %v3041_v12 }
 0x31b   :  { %2025 = vmatprep.mubr.bf16.mxu1 %v1864_v14 }
 0x31c   :  { %2026 = vmatmul.mubr.bf16.vlgmr.msra.gmra.mrb[20].mxu1 %v1863_v16 }
 0x31d   :  { %2746 = vmatpush3.bf16.msra.mxu1 %v3042_v15 }
 0x31e   :  { %2747 = vmatprep.subr.bf16.mxu1 %v3043_v17 }
 0x321   :  { %2748 = vmatpush3.bf16.msra.mxu1 %v3044_v18 }
 0x322   :  { %2749 = vmatprep.subr.bf16.mxu1 %v3045_v19 }
 0x325   :  { %2750 = vmatpush3.bf16.msra.mxu1 %v3046_v20 }
 0x326   :  { %2751 = vmatprep.subr.bf16.mxu1 %v3047_v21 }
 0x329   :  { %2752 = vmatpush3.bf16.msra.mxu1 %v3048_v22 }
 0x32a   :  { %2753 = vmatprep.subr.bf16.mxu1 %v3049_v23 }
 0x32d   :  { %2754 = vmatpush3.bf16.msra.mxu1 %v3050_v24 }
 0x32e   :  { %2755 = vmatprep.subr.bf16.mxu1 %v3051_v38 }
 0x331   :  { %2756 = vmatpush3.bf16.msra.mxu1 %v3052_v25 }
 0x332   :  { %2757 = vmatprep.subr.bf16.mxu1 %v3053_v29 }
 0x333   :  { %v2176_v34 = vpop.f32.mrb[24].mxu0 }
 0x334   :  { %v2177_v35 = vadd.f32 %v2176_v34, %v2055_v30  ;;  %v2178_v36 = vpop.f32.mrb[25].mxu0 }
 0x335   :  { %v2179_v37 = vadd.f32 %v2178_v36, %v2059_v31  ;;  %v2180_v39 = vpop.f32.mrb[26].mxu0  ;;  %2758 = vmatpush3.bf16.msra.mxu1 %v3054_v32 }
 0x336   :  { %v2183_v42 = vmax.f32 %v2177_v35, 0.0  ;;  %v2181_v43 = vpop.f32.mrb[27].mxu0  ;;  %2759 = vmatprep.subr.bf16.mxu1 %v3055_v33 }
 0x337   :  { %v2184_v44 = vmax.f32 %v2179_v37, 0.0 }
 0x338   :  { %v2185_v26 = vpack.c.bf16 %v2183_v42, %v2183_v42 }
 0x339   :  { %v2186_v45 = vpack.c.bf16 %v2184_v44, %v2184_v44  ;;  %2760 = vmatpush3.bf16.msra.mxu1 %v3056_v41 }
 0x33b   :  { %2347 = vmatprep.mubr.bf16.mxu1 %v2186_v45 }
 0x33c   :  { %2348 = vmatmul.mubr.bf16.vlgmr.msra.gmra.mrb[24].mxu1 %v2185_v26 }
 0x38f   :  { %v2673_v27 = vpop.f32.mrb[8].mxu1 }
 0x390   :  { %v2674_v59 = vpop.f32.mrb[9].mxu1 }
 0x391   :  { %v2675_v46 = vadd.f32 %v2674_v59, %v2673_v27  ;;  %v2676_v47 = vpop.f32.mrb[10].mxu1 }
 0x392   :  { %v2677_v48 = vpop.f32.mrb[11].mxu1 }
 0x393   :  { %v1067_v49 = vadd.f32 %v2675_v46, %v3291_v40 }
 0x3af   :  { %v2695_v50 = vpop.f32.mrb[12].mxu1 }
 0x3b0   :  { %v2696_v51 = vpop.f32.mrb[13].mxu1 }
 0x3b1   :  { %v2697_v52 = vadd.f32 %v2696_v51, %v2695_v50  ;;  %v2698_v53 = vpop.f32.mrb[14].mxu1 }
 0x3b2   :  { %v2699_v54 = vpop.f32.mrb[15].mxu1 }
 0x3b3   :  { %v1389_v55 = vadd.f32 %v2697_v52, %v1067_v49 }
 0x3cf   :  { %v2717_v56 = vpop.f32.mrb[16].mxu1 }
 0x3d0   :  { %v2718_v57 = vpop.f32.mrb[17].mxu1 }
 0x3d1   :  { %v2719_v58 = vadd.f32 %v2718_v57, %v2717_v56  ;;  %v2720_v60 = vpop.f32.mrb[18].mxu1 }
 0x3d2   :  { %v2721_v61 = vpop.f32.mrb[19].mxu1 }
 0x3d3   :  { %v1711_v62 = vadd.f32 %v2719_v58, %v1389_v55 }
 0x3ef   :  { %v2739_v63 = vpop.f32.mrb[20].mxu1 }
 0x3f0   :  { %v2740_v0 = vpop.f32.mrb[21].mxu1 }
 0x3f1   :  { %v2741_v1 = vadd.f32 %v2740_v0, %v2739_v63  ;;  %v2742_v2 = vpop.f32.mrb[22].mxu1 }
 0x3f2   :  { %v2743_v3 = vpop.f32.mrb[23].mxu1 }
 0x3f3   :  { %v2033_v4 = vadd.f32 %v2741_v1, %v1711_v62 }
 0x40f   :  { %v2761_v5 = vpop.f32.mrb[24].mxu1 }
 0x410   :  { %v2762_v40 = vpop.f32.mrb[25].mxu1 }
 0x411   :  { %v2763_v6 = vadd.f32 %v2762_v40, %v2761_v5  ;;  %v2764_v7 = vpop.f32.mrb[26].mxu1 }
 0x412   :  { %v2765_v8 = vpop.f32.mrb[27].mxu1 }
 0x413   :  { %v2355_v10 = vadd.f32 %v2763_v6, %v2033_v4 }
 0x415   :  { %v2363_v11 = vadd.f32 %v2612_v9, %v2355_v10 }
 0x417   :  { %v2364_v12 = vmul.f32 %v2363_v11, %v2363_v11 }
 0x419   :  { %2365 = vadd.xlane.f32.xlu0 %v2364_v12 }
 0x4a6   :  { %v2366_v13 = vpop.xlane.xlu0 %2365 }
 0x4a7   :  { %v2367_v14 = vmax.f32 %v2366_v13, 1e-24 }
 0x4a9   :  { %3057 = vrsqrt.f32 %v2367_v14 }
 0x4b3   :  { %v3058_v15 = vpop.eup %3057 }
 0x4b4   :  { %v2369_v16 = vmul.f32 %v3058_v15, %v2363_v11 }
 0x4b6   :  { %2370 = vst [vmem:[#allocation10] sm:$0xff] %v2369_v16 }
 0x4b7   :  { %3158 = shalt.err (!%p3155_p8)
}
 0x4b8   :  { %s3159_s21 = scalar_lea.hbm %s3324_s5, 128 }
 0x4b9   :  { %p3160_p9 = scmp.ne.s32.totalorder %s3324_s5, %s3159_s21  ;;  %p3163_p10 = scmp.lt.u32.totalorder %s3159_s21, %s3324_s5 }
 0x4bb   :  { %p3165_p11 = pnand %p3163_p10, %p3160_p9 }
 0x4bd   :  { %3168 = shalt.err (!%p3165_p11)
}
 0x4be   :  { %2380 = dma.vmem_to_hbm [thread:$0]  %s2378_s18, 128, %s3324_s5, [#allocation4]  }
 0x4bf   :  { %3175 = dma.done.wait [#allocation4], 128  }
 0x4c0   :  { %3176 = vsyncadd [#allocation4], 4294967168 }
 0x4c1   :  { %2384 = vsyncpa [#allocation3], 1 }
 0x4c2   :  { %2385 = vsyncpa [#allocation6], 1 }
 0x4c3   :  { %2386 = vsyncpa [#allocation9], 1 }
 0x4c4   :  { %2387 = vsyncpa [#allocation4], 1 }

</bundles_post_ra>
